<compile_context>
chip_gen: v6e
topology: v6e:2x2x1
jax: 0.10.0
libtpu: 0.0.40
codegen_flags: <defaults>
</compile_context>

<pallas_src>
import functools
import math

import jax
import jax.numpy as jnp
from jax import lax
from jax.experimental import pallas as pl
from jax.experimental.pallas import tpu as pltpu


def _bspec(s, c):
    return pl.BlockSpec((1, s, c), lambda b: (b, 0, 0))


def _wspec(shape):
    return pl.BlockSpec(shape, lambda b: (0, 0))


# -------------------- fully fused mLSTM block kernel ------------------------

def _mlstm_block_kernel(x_ref, nw_ref, nb_ref, up_w_ref, up_b_ref,
                        cw_ref, cb_ref, qk_w_ref, qk_b_ref,
                        v_w_ref, v_b_ref, gqk_w_ref, gv_w_ref, g_b_ref,
                        gn_w_ref, skip_ref, dn_w_ref, dn_b_ref,
                        o_ref, h_scr,
                        *, seq_len, ksize, inner, num_heads, head_dim):
    s = seq_len
    nh = num_heads
    x = x_ref[0]                                               # (S, D) f32

    # ---- LayerNorm ----------------------------------------------------------
    mu = jnp.mean(x, axis=-1, keepdims=True)
    var = jnp.mean((x - mu) ** 2, axis=-1, keepdims=True)
    xn = (x - mu) * lax.rsqrt(var + 1e-5) * nw_ref[...] + nb_ref[...]

    # ---- fused up-projection: [x_mlstm | z] in one dot ----------------------
    up = (jnp.dot(xn.astype(jnp.bfloat16), up_w_ref[...],
                  preferred_element_type=jnp.float32) + up_b_ref[...])
    xm = up[:, :inner]                                         # (S, inner)
    z = up[:, inner:]                                          # (S, inner)

    # ---- causal depthwise conv (roll + row mask) + SiLU ---------------------
    rid = lax.broadcasted_iota(jnp.int32, (s, 1), 0)
    cw = cw_ref[...]                                           # (K, inner)
    acc = xm * cw[ksize - 1:ksize, :]                          # tap K-1, shift 0
    for tap in range(ksize - 1):
        d = ksize - 1 - tap
        shifted = jnp.where(rid >= d, pltpu.roll(xm, d, axis=0), 0.0)
        acc = acc + shifted * cw[tap:tap + 1, :]
    acc = acc + cb_ref[...]
    xc = acc * jax.nn.sigmoid(acc)                             # SiLU

    # ---- fused q|k, v and gate projections -----------------------------------
    xc_b = xc.astype(jnp.bfloat16)
    xm_b = xm.astype(jnp.bfloat16)
    qk = (jnp.dot(xc_b, qk_w_ref[...], preferred_element_type=jnp.float32)
          + qk_b_ref[...])                                     # (S, 2*inner), k pre-scaled
    v = (jnp.dot(xm_b, v_w_ref[...], preferred_element_type=jnp.float32)
         + v_b_ref[...])                                       # (S, inner)
    gates = (jnp.dot(qk, gqk_w_ref[...], preferred_element_type=jnp.float32)
             + jnp.dot(v, gv_w_ref[...], preferred_element_type=jnp.float32)
             + g_b_ref[...])                                   # (S, 2*NH) = [ig | fg]

    # ---- stabilized parallel mLSTM cell (batched over heads) ----------------
    ig = gates[:, :nh]                                         # (S, NH)
    fg = gates[:, nh:]                                         # (S, NH)

    # inclusive cumsum of log_sigmoid(fgate) over time via log2(S) roll-and-add
    c = jax.nn.log_sigmoid(fg)                                 # (S, NH)
    shift = 1
    while shift < s:
        c = c + jnp.where(rid >= shift, pltpu.roll(c, shift, axis=0), 0.0)
        shift *= 2

    t_idx = lax.broadcasted_iota(jnp.int32, (s, s), 0)
    j_idx = lax.broadcasted_iota(jnp.int32, (s, s), 1)
    ltr = (t_idx >= j_idx)[None]                               # (1, S, S)

    # head-major stacks (leading NH axis; no minor-dim reshapes)
    c_col = jnp.stack([c[:, h:h + 1] for h in range(nh)], axis=0)        # (NH,S,1)
    c_row = jnp.stack([c[:, h:h + 1].T for h in range(nh)], axis=0)      # (NH,1,S)
    ig_row = jnp.stack([ig[:, h:h + 1].T for h in range(nh)], axis=0)    # (NH,1,S)

    log_d = jnp.where(ltr, c_col - c_row, -jnp.inf) + ig_row             # (NH,S,S)
    max_log_d = jnp.max(log_d, axis=-1, keepdims=True)                   # (NH,S,1)
    d_mat = jnp.exp(log_d - max_log_d)

    qh = jnp.stack([qk[:, h * head_dim:(h + 1) * head_dim]
                    for h in range(nh)], axis=0).astype(jnp.bfloat16)    # (NH,S,DH)
    kh = jnp.stack([qk[:, inner + h * head_dim: inner + (h + 1) * head_dim]
                    for h in range(nh)], axis=0).astype(jnp.bfloat16)    # (NH,S,DH)
    vh = jnp.stack([v[:, h * head_dim:(h + 1) * head_dim]
                    for h in range(nh)], axis=0).astype(jnp.bfloat16)    # (NH,S,DH)

    s_mat = jnp.einsum('hqd,hkd->hqk', qh, kh,
                       preferred_element_type=jnp.float32)               # (NH,S,S)
    c_mat = s_mat * d_mat
    normalizer = jnp.maximum(jnp.abs(jnp.sum(c_mat, axis=-1, keepdims=True)),
                             jnp.exp(-max_log_d))
    c_norm = c_mat * pl.reciprocal(normalizer + 1e-6, approx=True)
    hh = jnp.einsum('hqk,hkd->hqd', c_norm.astype(jnp.bfloat16), vh,
                    preferred_element_type=jnp.float32)                  # (NH,S,DH)

    # per-head group norm (mean/var over DH), learnable scale, no bias
    gmu = jnp.mean(hh, axis=-1, keepdims=True)
    gvar = jnp.mean((hh - gmu) ** 2, axis=-1, keepdims=True)
    hn = (hh - gmu) * lax.rsqrt(gvar + 1e-5)                             # (NH,S,DH)

    # lane-dense assembly into VMEM scratch (single read back, no concat)
    gnw = gn_w_ref[...]                                                  # (NH, DH)
    for h in range(nh):
        h_scr[:, h * head_dim:(h + 1) * head_dim] = hn[h] * gnw[h:h + 1, :]
    h_tilde = h_scr[...]                                                 # (S, inner)

    # ---- skip + SiLU output gate + down-projection + residual ---------------
    hg = (h_tilde + skip_ref[...] * xc) * (z * jax.nn.sigmoid(z))
    y = (jnp.dot(hg.astype(jnp.bfloat16), dn_w_ref[...],
                 preferred_element_type=jnp.float32) + dn_b_ref[...])
    o_ref[0] = x + y                                                     # residual


# ------------------------------ out LayerNorm -------------------------------

def _out_ln_kernel(x_ref, w_ref, b_ref, o_ref):
    x = x_ref[0]
    mu = jnp.mean(x, axis=-1, keepdims=True)
    var = jnp.mean((x - mu) ** 2, axis=-1, keepdims=True)
    o_ref[0] = (x - mu) * lax.rsqrt(var + 1e-5) * w_ref[...] + b_ref[...]


# ----------------------------- block / wrapper ------------------------------

def _block_vmem_limit(s, d, inner, num_heads):
    """Rough double-buffered VMEM footprint estimate, clamped to chip-safe range."""
    f32 = 4
    est = f32 * (4 * s * d                      # x in / out, double-buffered
                 + 10 * s * inner               # up/xm/z/xc/qk/v/h temporaries
                 + 5 * num_heads * s * s        # (NH,S,S) logD / D / C / Cnorm
                 + s * inner)                   # scratch
    est += 2 * (d * 2 * inner + inner * 2 * inner + inner * inner + inner * d)
    est += f32 * (4 * inner * 2 * num_heads)
    return int(min(max(2 * est, 32 * 1024 * 1024), 64 * 1024 * 1024))


def mlstm_block_forward(x, p, num_heads):
    bsz, s, d = x.shape
    inner = p["v_w"].shape[1]
    head_dim = inner // num_heads
    ksize = p["conv_w"].shape[0]
    nh2 = 2 * num_heads

    kernel = functools.partial(
        _mlstm_block_kernel, seq_len=s, ksize=ksize, inner=inner,
        num_heads=num_heads, head_dim=head_dim)

    return pl.pallas_call(
        kernel,
        out_shape=jax.ShapeDtypeStruct((bsz, s, d), jnp.float32),
        grid=(bsz,),
        in_specs=[_bspec(s, d),
                  _wspec((1, d)), _wspec((1, d)),                # LN
                  _wspec((d, 2 * inner)), _wspec((1, 2 * inner)),  # up-proj
                  _wspec((ksize, inner)), _wspec((1, inner)),    # conv
                  _wspec((inner, 2 * inner)), _wspec((1, 2 * inner)),  # q|k
                  _wspec((inner, inner)), _wspec((1, inner)),    # v
                  _wspec((2 * inner, nh2)), _wspec((inner, nh2)),
                  _wspec((1, nh2)),                              # gates
                  _wspec((num_heads, head_dim)),                 # group norm
                  _wspec((1, inner)),                            # learnable skip
                  _wspec((inner, d)), _wspec((1, d))],           # down-proj
        out_specs=_bspec(s, d),
        scratch_shapes=[pltpu.VMEM((s, inner), jnp.float32)],
        compiler_params=pltpu.CompilerParams(
            dimension_semantics=("parallel",),
            vmem_limit_bytes=_block_vmem_limit(s, d, inner, num_heads)),
    )(x, p["norm_w"], p["norm_b"], p["up_w"], p["up_b"],
      p["conv_w"], p["conv_b"], p["qk_w"], p["qk_b"], p["v_w"], p["v_b"],
      p["gqk_w"], p["gv_w"], p["g_b"], p["gn_w"], p["skip"],
      p["down_w"], p["down_b"])


def out_layernorm(x, w, b):
    bsz, s, d = x.shape
    return pl.pallas_call(
        _out_ln_kernel,
        out_shape=jax.ShapeDtypeStruct((bsz, s, d), jnp.float32),
        grid=(bsz,),
        in_specs=[_bspec(s, d), _wspec((1, d)), _wspec((1, d))],
        out_specs=_bspec(s, d),
        compiler_params=pltpu.CompilerParams(
            dimension_semantics=("parallel",)),
    )(x, w, b)


def mlstm_wrapper_forward(params, x, num_heads):
    # dropout(p=0.2) is identity in eval mode.
    bsz, len_seq, d = x.shape
    pad_len = max(16 - len_seq,
                  2 ** int(math.ceil(math.log2(len_seq))) - len_seq)
    xp = jnp.concatenate([jnp.zeros((bsz, pad_len, d), x.dtype), x], axis=1)
    for blk in params["blocks"]:
        xp = mlstm_block_forward(xp, blk, num_heads)
    out = out_layernorm(xp, params["out_norm_w"], params["out_norm_b"])
    return out[:, pad_len:, :]


# --------------------------------- params -----------------------------------

def init_params(key, embed_dim, num_heads, num_blocks, conv_k=4, proj_factor=2):
    inner = proj_factor * embed_dim
    head_dim = inner // num_heads
    assert head_dim * num_heads == inner
    nh2 = 2 * num_heads
    k_scale = 1.0 / math.sqrt(head_dim)

    def nrm(k, shape, scale=0.02):
        return scale * jax.random.normal(k, shape, jnp.float32)

    blocks = []
    for b in range(num_blocks):
        ks = jax.random.split(jax.random.fold_in(key, b), 9)
        # fused up-projection [x_mlstm half | z half]
        up_w = jnp.concatenate([nrm(ks[0], (embed_dim, inner)),
                                nrm(ks[1], (embed_dim, inner))], axis=1)
        # fused q|k projection; fold 1/sqrt(head_dim) into the k half
        q_w = nrm(ks[3], (inner, inner))
        k_w = nrm(ks[4], (inner, inner))
        qk_w = jnp.concatenate([q_w, k_w * k_scale], axis=1)
        # gate weights consume the (scaled-k) q|k output -> compensate k rows
        gq_w = nrm(ks[5], (inner, nh2))
        gk_w = nrm(ks[6], (inner, nh2))
        gqk_w = jnp.concatenate([gq_w, gk_w / k_scale], axis=0)
        blocks.append({
            "norm_w": jnp.ones((1, embed_dim), jnp.float32),
            "norm_b": jnp.zeros((1, embed_dim), jnp.float32),
            "up_w": up_w.astype(jnp.bfloat16),
            "up_b": jnp.zeros((1, 2 * inner), jnp.float32),
            "conv_w": nrm(ks[2], (conv_k, inner), 0.1),
            "conv_b": jnp.zeros((1, inner), jnp.float32),
            "qk_w": qk_w.astype(jnp.bfloat16),
            "qk_b": jnp.zeros((1, 2 * inner), jnp.float32),
            "v_w": nrm(ks[7], (inner, inner)).astype(jnp.bfloat16),
            "v_b": jnp.zeros((1, inner), jnp.float32),
            "gqk_w": gqk_w,                                   # f32 (gate path)
            "gv_w": nrm(ks[8], (inner, nh2)),                 # f32 (gate path)
            "g_b": jnp.concatenate(
                [jnp.zeros((num_heads,), jnp.float32),
                 jnp.linspace(3.0, 6.0, num_heads).astype(jnp.float32)]
            ).reshape(1, nh2),
            "gn_w": jnp.ones((num_heads, head_dim), jnp.float32),
            "skip": jnp.ones((1, inner), jnp.float32),
            "down_w": nrm(jax.random.fold_in(ks[8], 1),
                          (inner, embed_dim)).astype(jnp.bfloat16),
            "down_b": jnp.zeros((1, embed_dim), jnp.float32),
        })
    return {
        "blocks": blocks,
        "out_norm_w": jnp.ones((1, embed_dim), jnp.float32),
        "out_norm_b": jnp.zeros((1, embed_dim), jnp.float32),
    }


if __name__ == "__main__":
    key = jax.random.PRNGKey(0)
    B, L, D = 2, 8, 32          # batch, seq, embedding
    NUM_HEADS = 2
    NUM_BLOCKS = 2

    pkey, xkey = jax.random.split(key)
    params = init_params(pkey, D, NUM_HEADS, NUM_BLOCKS)
    x = jax.random.normal(xkey, (B, L, D), jnp.float32)

    fwd = jax.jit(functools.partial(mlstm_wrapper_forward, num_heads=NUM_HEADS))
    y = fwd(params, x)
    jax.block_until_ready(y)
    assert y.shape == (B, L, D) and y.dtype == jnp.float32
    assert bool(jnp.all(jnp.isfinite(y)))
    print("KERNEL_OK")
</pallas_src>

<mosaic_0001>
module attributes {stable_mosaic.version = 11 : i64} {
  func.func @_out_ln_kernel(%arg0: i32, %arg1: memref<1x16x32xf32, #tpu.memory_space<vmem>>, %arg2: memref<1x32xf32, #tpu.memory_space<vmem>>, %arg3: memref<1x32xf32, #tpu.memory_space<vmem>>, %arg4: memref<1x16x32xf32, #tpu.memory_space<vmem>>) attributes {dimension_semantics = [#tpu.dimension_semantics<parallel>], iteration_bounds = array<i64: 2>, scalar_prefetch = 0 : i64, scratch_operands = 0 : i64, tpu.core_type = #tpu.core_type<tc>, window_params = [{transform_indices = @transform_0, window_bounds = array<i64: 1, 16, 32>}, {pipeline_mode = #tpu.pipeline_mode<synchronous>, transform_indices = @transform_1, window_bounds = array<i64: 1, 32>}, {pipeline_mode = #tpu.pipeline_mode<synchronous>, transform_indices = @transform_2, window_bounds = array<i64: 1, 32>}, {transform_indices = @transform_3, window_bounds = array<i64: 1, 16, 32>}]} {
    %c0 = arith.constant 0 : index
    %c0_0 = arith.constant 0 : index
    %c0_1 = arith.constant 0 : index
    %0 = vector.load %arg1[%c0, %c0_0, %c0_1] : memref<1x16x32xf32, #tpu.memory_space<vmem>>, vector<1x16x32xf32>
    %1 = vector.shape_cast %0 : vector<1x16x32xf32> to vector<16x32xf32>
    %cst = arith.constant dense<0.000000e+00> : vector<16xf32>
    %2 = vector.multi_reduction <add>, %1, %cst [1] : vector<16x32xf32> to vector<16xf32>
    %3 = vector.shape_cast %2 : vector<16xf32> to vector<16x1xf32>
    %cst_2 = arith.constant 3.200000e+01 : f32
    %4 = vector.broadcast %cst_2 : f32 to vector<16x1xf32>
    %5 = arith.divf %3, %4 : vector<16x1xf32>
    %6 = vector.broadcast %5 : vector<16x1xf32> to vector<16x32xf32>
    %7 = arith.subf %1, %6 : vector<16x32xf32>
    %8 = arith.mulf %7, %7 : vector<16x32xf32>
    %cst_3 = arith.constant dense<0.000000e+00> : vector<16xf32>
    %9 = vector.multi_reduction <add>, %8, %cst_3 [1] : vector<16x32xf32> to vector<16xf32>
    %10 = vector.shape_cast %9 : vector<16xf32> to vector<16x1xf32>
    %cst_4 = arith.constant 3.200000e+01 : f32
    %11 = vector.broadcast %cst_4 : f32 to vector<16x1xf32>
    %12 = arith.divf %10, %11 : vector<16x1xf32>
    %13 = vector.broadcast %5 : vector<16x1xf32> to vector<16x32xf32>
    %14 = arith.subf %1, %13 : vector<16x32xf32>
    %cst_5 = arith.constant 9.99999974E-6 : f32
    %15 = vector.broadcast %cst_5 : f32 to vector<16x1xf32>
    %16 = arith.addf %12, %15 : vector<16x1xf32>
    %17 = math.rsqrt %16 : vector<16x1xf32>
    %18 = vector.broadcast %17 : vector<16x1xf32> to vector<16x32xf32>
    %19 = arith.mulf %14, %18 : vector<16x32xf32>
    %c0_6 = arith.constant 0 : index
    %c0_7 = arith.constant 0 : index
    %20 = vector.load %arg2[%c0_6, %c0_7] : memref<1x32xf32, #tpu.memory_space<vmem>>, vector<1x32xf32>
    %21 = vector.broadcast %20 : vector<1x32xf32> to vector<16x32xf32>
    %22 = arith.mulf %19, %21 : vector<16x32xf32>
    %c0_8 = arith.constant 0 : index
    %c0_9 = arith.constant 0 : index
    %23 = vector.load %arg3[%c0_8, %c0_9] : memref<1x32xf32, #tpu.memory_space<vmem>>, vector<1x32xf32>
    %24 = vector.broadcast %23 : vector<1x32xf32> to vector<16x32xf32>
    %25 = arith.addf %22, %24 : vector<16x32xf32>
    %c0_10 = arith.constant 0 : index
    %c0_11 = arith.constant 0 : index
    %c0_12 = arith.constant 0 : index
    %26 = vector.load %arg4[%c0_10, %c0_11, %c0_12] : memref<1x16x32xf32, #tpu.memory_space<vmem>>, vector<1x16x32xf32>
    %27 = vector.shape_cast %26 : vector<1x16x32xf32> to vector<16x32xf32>
    %28 = vector.shape_cast %25 : vector<16x32xf32> to vector<1x16x32xf32>
    tpu.vector_store %arg4[%c0_10, %c0_11, %c0_12], %28 {strides = array<i32>} : memref<1x16x32xf32, #tpu.memory_space<vmem>>, vector<1x16x32xf32>,
    return
  }
  func.func @transform_0(%arg0: i32) -> (i32, i32, i32) {
    %c0_i32 = arith.constant 0 : i32
    %c0_i32_0 = arith.constant 0 : i32
    %c0_i32_1 = arith.constant 0 : i32
    return %arg0, %c0_i32, %c0_i32_0 : i32, i32, i32
  }
  func.func @transform_1(%arg0: i32) -> (i32, i32) {
    %c0_i32 = arith.constant 0 : i32
    %c0_i32_0 = arith.constant 0 : i32
    %c0_i32_1 = arith.constant 0 : i32
    return %c0_i32, %c0_i32_0 : i32, i32
  }
  func.func @transform_2(%arg0: i32) -> (i32, i32) {
    %c0_i32 = arith.constant 0 : i32
    %c0_i32_0 = arith.constant 0 : i32
    %c0_i32_1 = arith.constant 0 : i32
    return %c0_i32, %c0_i32_0 : i32, i32
  }
  func.func @transform_3(%arg0: i32) -> (i32, i32, i32) {
    %c0_i32 = arith.constant 0 : i32
    %c0_i32_0 = arith.constant 0 : i32
    %c0_i32_1 = arith.constant 0 : i32
    return %arg0, %c0_i32, %c0_i32_0 : i32, i32, i32
  }
}

module attributes {stable_mosaic.version = 11 : i64} {
  func.func @_mlstm_block_kernel(%arg0: i32, %arg1: memref<1x16x32xf32, #tpu.memory_space<vmem>>, %arg2: memref<1x32xf32, #tpu.memory_space<vmem>>, %arg3: memref<1x32xf32, #tpu.memory_space<vmem>>, %arg4: memref<32x128xbf16, #tpu.memory_space<vmem>>, %arg5: memref<1x128xf32, #tpu.memory_space<vmem>>, %arg6: memref<4x64xf32, #tpu.memory_space<vmem>>, %arg7: memref<1x64xf32, #tpu.memory_space<vmem>>, %arg8: memref<64x128xbf16, #tpu.memory_space<vmem>>, %arg9: memref<1x128xf32, #tpu.memory_space<vmem>>, %arg10: memref<64x64xbf16, #tpu.memory_space<vmem>>, %arg11: memref<1x64xf32, #tpu.memory_space<vmem>>, %arg12: memref<128x4xf32, #tpu.memory_space<vmem>>, %arg13: memref<64x4xf32, #tpu.memory_space<vmem>>, %arg14: memref<1x4xf32, #tpu.memory_space<vmem>>, %arg15: memref<2x32xf32, #tpu.memory_space<vmem>>, %arg16: memref<1x64xf32, #tpu.memory_space<vmem>>, %arg17: memref<64x32xbf16, #tpu.memory_space<vmem>>, %arg18: memref<1x32xf32, #tpu.memory_space<vmem>>, %arg19: memref<1x16x32xf32, #tpu.memory_space<vmem>>, %arg20: memref<16x64xf32, #tpu.memory_space<vmem>>) attributes {dimension_semantics = [#tpu.dimension_semantics<parallel>], iteration_bounds = array<i64: 2>, scalar_prefetch = 0 : i64, scratch_operands = 1 : i64, tpu.core_type = #tpu.core_type<tc>, window_params = [{transform_indices = @transform_0, window_bounds = array<i64: 1, 16, 32>}, {pipeline_mode = #tpu.pipeline_mode<synchronous>, transform_indices = @transform_1, window_bounds = array<i64: 1, 32>}, {pipeline_mode = #tpu.pipeline_mode<synchronous>, transform_indices = @transform_2, window_bounds = array<i64: 1, 32>}, {pipeline_mode = #tpu.pipeline_mode<synchronous>, transform_indices = @transform_3, window_bounds = array<i64: 32, 128>}, {pipeline_mode = #tpu.pipeline_mode<synchronous>, transform_indices = @transform_4, window_bounds = array<i64: 1, 128>}, {pipeline_mode = #tpu.pipeline_mode<synchronous>, transform_indices = @transform_5, window_bounds = array<i64: 4, 64>}, {pipeline_mode = #tpu.pipeline_mode<synchronous>, transform_indices = @transform_6, window_bounds = array<i64: 1, 64>}, {pipeline_mode = #tpu.pipeline_mode<synchronous>, transform_indices = @transform_7, window_bounds = array<i64: 64, 128>}, {pipeline_mode = #tpu.pipeline_mode<synchronous>, transform_indices = @transform_8, window_bounds = array<i64: 1, 128>}, {pipeline_mode = #tpu.pipeline_mode<synchronous>, transform_indices = @transform_9, window_bounds = array<i64: 64, 64>}, {pipeline_mode = #tpu.pipeline_mode<synchronous>, transform_indices = @transform_10, window_bounds = array<i64: 1, 64>}, {pipeline_mode = #tpu.pipeline_mode<synchronous>, transform_indices = @transform_11, window_bounds = array<i64: 128, 4>}, {pipeline_mode = #tpu.pipeline_mode<synchronous>, transform_indices = @transform_12, window_bounds = array<i64: 64, 4>}, {pipeline_mode = #tpu.pipeline_mode<synchronous>, transform_indices = @transform_13, window_bounds = array<i64: 1, 4>}, {pipeline_mode = #tpu.pipeline_mode<synchronous>, transform_indices = @transform_14, window_bounds = array<i64: 2, 32>}, {pipeline_mode = #tpu.pipeline_mode<synchronous>, transform_indices = @transform_15, window_bounds = array<i64: 1, 64>}, {pipeline_mode = #tpu.pipeline_mode<synchronous>, transform_indices = @transform_16, window_bounds = array<i64: 64, 32>}, {pipeline_mode = #tpu.pipeline_mode<synchronous>, transform_indices = @transform_17, window_bounds = array<i64: 1, 32>}, {transform_indices = @transform_18, window_bounds = array<i64: 1, 16, 32>}]} {
    %c0 = arith.constant 0 : index
    %c0_0 = arith.constant 0 : index
    %c0_1 = arith.constant 0 : index
    %0 = vector.load %arg1[%c0, %c0_0, %c0_1] : memref<1x16x32xf32, #tpu.memory_space<vmem>>, vector<1x16x32xf32>
    %1 = vector.shape_cast %0 : vector<1x16x32xf32> to vector<16x32xf32>
    %cst = arith.constant dense<0.000000e+00> : vector<16xf32>
    %2 = vector.multi_reduction <add>, %1, %cst [1] : vector<16x32xf32> to vector<16xf32>
    %3 = vector.shape_cast %2 : vector<16xf32> to vector<16x1xf32>
    %cst_2 = arith.constant 3.200000e+01 : f32
    %4 = vector.broadcast %cst_2 : f32 to vector<16x1xf32>
    %5 = arith.divf %3, %4 : vector<16x1xf32>
    %6 = vector.broadcast %5 : vector<16x1xf32> to vector<16x32xf32>
    %7 = arith.subf %1, %6 : vector<16x32xf32>
    %8 = arith.mulf %7, %7 : vector<16x32xf32>
    %cst_3 = arith.constant dense<0.000000e+00> : vector<16xf32>
    %9 = vector.multi_reduction <add>, %8, %cst_3 [1] : vector<16x32xf32> to vector<16xf32>
    %10 = vector.shape_cast %9 : vector<16xf32> to vector<16x1xf32>
    %cst_4 = arith.constant 3.200000e+01 : f32
    %11 = vector.broadcast %cst_4 : f32 to vector<16x1xf32>
    %12 = arith.divf %10, %11 : vector<16x1xf32>
    %13 = vector.broadcast %5 : vector<16x1xf32> to vector<16x32xf32>
    %14 = arith.subf %1, %13 : vector<16x32xf32>
    %cst_5 = arith.constant 9.99999974E-6 : f32
    %15 = vector.broadcast %cst_5 : f32 to vector<16x1xf32>
    %16 = arith.addf %12, %15 : vector<16x1xf32>
    %17 = math.rsqrt %16 : vector<16x1xf32>
    %18 = vector.broadcast %17 : vector<16x1xf32> to vector<16x32xf32>
    %19 = arith.mulf %14, %18 : vector<16x32xf32>
    %c0_6 = arith.constant 0 : index
    %c0_7 = arith.constant 0 : index
    %20 = vector.load %arg2[%c0_6, %c0_7] : memref<1x32xf32, #tpu.memory_space<vmem>>, vector<1x32xf32>
    %21 = vector.broadcast %20 : vector<1x32xf32> to vector<16x32xf32>
    %22 = arith.mulf %19, %21 : vector<16x32xf32>
    %c0_8 = arith.constant 0 : index
    %c0_9 = arith.constant 0 : index
    %23 = vector.load %arg3[%c0_8, %c0_9] : memref<1x32xf32, #tpu.memory_space<vmem>>, vector<1x32xf32>
    %24 = vector.broadcast %23 : vector<1x32xf32> to vector<16x32xf32>
    %25 = arith.addf %22, %24 : vector<16x32xf32>
    %26 = arith.truncf %25 : vector<16x32xf32> to vector<16x32xbf16>
    %c0_10 = arith.constant 0 : index
    %c0_11 = arith.constant 0 : index
    %27 = vector.load %arg4[%c0_10, %c0_11] : memref<32x128xbf16, #tpu.memory_space<vmem>>, vector<32x128xbf16>
    %cst_12 = arith.constant dense<0.000000e+00> : vector<16x128xf32>
    %28 = tpu.matmul %26, %27, %cst_12 {dimension_numbers = #tpu.dot_dimension_numbers<[1], [0], [0], [1], [0, 0, 1, 1], [], []>} : vector<16x32xbf16>, vector<32x128xbf16>, vector<16x128xf32> -> vector<16x128xf32>
    %c0_13 = arith.constant 0 : index
    %c0_14 = arith.constant 0 : index
    %29 = vector.load %arg5[%c0_13, %c0_14] : memref<1x128xf32, #tpu.memory_space<vmem>>, vector<1x128xf32>
    %30 = vector.broadcast %29 : vector<1x128xf32> to vector<16x128xf32>
    %31 = arith.addf %28, %30 : vector<16x128xf32>
    %32 = vector.extract_strided_slice %31 {offsets = [0, 0], sizes = [16, 64], strides = [1, 1]} : vector<16x128xf32> to vector<16x64xf32>
    %33 = vector.extract_strided_slice %31 {offsets = [0, 64], sizes = [16, 64], strides = [1, 1]} : vector<16x128xf32> to vector<16x64xf32>
    %34 = tpu.iota {dimensions = array<i32: 0>} : vector<16x1xi32>
    %c0_15 = arith.constant 0 : index
    %c0_16 = arith.constant 0 : index
    %35 = vector.load %arg6[%c0_15, %c0_16] : memref<4x64xf32, #tpu.memory_space<vmem>>, vector<4x64xf32>
    %36 = vector.extract_strided_slice %35 {offsets = [3, 0], sizes = [1, 64], strides = [1, 1]} : vector<4x64xf32> to vector<1x64xf32>
    %37 = vector.broadcast %36 : vector<1x64xf32> to vector<16x64xf32>
    %38 = arith.mulf %32, %37 : vector<16x64xf32>
    %c3_i32 = arith.constant 3 : i32
    %39 = vector.broadcast %c3_i32 : i32 to vector<16x1xi32>
    %40 = arith.cmpi sge, %34, %39 : vector<16x1xi32>
    %c3_i32_17 = arith.constant 3 : i32
    %41 = tpu.dynamic_rotate %32 by %c3_i32_17 dim 0 : vector<16x64xf32>, i32 -> vector<16x64xf32>
    %cst_18 = arith.constant 0.000000e+00 : f32
    %42 = vector.shape_cast %40 : vector<16x1xi1> to vector<16x1xi1>
    %43 = vector.broadcast %42 : vector<16x1xi1> to vector<16x64xi1>
    %44 = vector.broadcast %cst_18 : f32 to vector<16x64xf32>
    %45 = arith.select %43, %41, %44 : vector<16x64xi1>, vector<16x64xf32>
    %46 = vector.extract_strided_slice %35 {offsets = [0, 0], sizes = [1, 64], strides = [1, 1]} : vector<4x64xf32> to vector<1x64xf32>
    %47 = vector.broadcast %46 : vector<1x64xf32> to vector<16x64xf32>
    %48 = arith.mulf %45, %47 : vector<16x64xf32>
    %49 = arith.addf %38, %48 : vector<16x64xf32>
    %c2_i32 = arith.constant 2 : i32
    %50 = vector.broadcast %c2_i32 : i32 to vector<16x1xi32>
    %51 = arith.cmpi sge, %34, %50 : vector<16x1xi32>
    %c2_i32_19 = arith.constant 2 : i32
    %52 = tpu.dynamic_rotate %32 by %c2_i32_19 dim 0 : vector<16x64xf32>, i32 -> vector<16x64xf32>
    %cst_20 = arith.constant 0.000000e+00 : f32
    %53 = vector.shape_cast %51 : vector<16x1xi1> to vector<16x1xi1>
    %54 = vector.broadcast %53 : vector<16x1xi1> to vector<16x64xi1>
    %55 = vector.broadcast %cst_20 : f32 to vector<16x64xf32>
    %56 = arith.select %54, %52, %55 : vector<16x64xi1>, vector<16x64xf32>
    %57 = vector.extract_strided_slice %35 {offsets = [1, 0], sizes = [1, 64], strides = [1, 1]} : vector<4x64xf32> to vector<1x64xf32>
    %58 = vector.broadcast %57 : vector<1x64xf32> to vector<16x64xf32>
    %59 = arith.mulf %56, %58 : vector<16x64xf32>
    %60 = arith.addf %49, %59 : vector<16x64xf32>
    %c1_i32 = arith.constant 1 : i32
    %61 = vector.broadcast %c1_i32 : i32 to vector<16x1xi32>
    %62 = arith.cmpi sge, %34, %61 : vector<16x1xi32>
    %c1_i32_21 = arith.constant 1 : i32
    %63 = tpu.dynamic_rotate %32 by %c1_i32_21 dim 0 : vector<16x64xf32>, i32 -> vector<16x64xf32>
    %cst_22 = arith.constant 0.000000e+00 : f32
    %64 = vector.shape_cast %62 : vector<16x1xi1> to vector<16x1xi1>
    %65 = vector.broadcast %64 : vector<16x1xi1> to vector<16x64xi1>
    %66 = vector.broadcast %cst_22 : f32 to vector<16x64xf32>
    %67 = arith.select %65, %63, %66 : vector<16x64xi1>, vector<16x64xf32>
    %68 = vector.extract_strided_slice %35 {offsets = [2, 0], sizes = [1, 64], strides = [1, 1]} : vector<4x64xf32> to vector<1x64xf32>
    %69 = vector.broadcast %68 : vector<1x64xf32> to vector<16x64xf32>
    %70 = arith.mulf %67, %69 : vector<16x64xf32>
    %71 = arith.addf %60, %70 : vector<16x64xf32>
    %c0_23 = arith.constant 0 : index
    %c0_24 = arith.constant 0 : index
    %72 = vector.load %arg7[%c0_23, %c0_24] : memref<1x64xf32, #tpu.memory_space<vmem>>, vector<1x64xf32>
    %73 = vector.broadcast %72 : vector<1x64xf32> to vector<16x64xf32>
    %74 = arith.addf %71, %73 : vector<16x64xf32>
    %75 = arith.negf %74 : vector<16x64xf32>
    %76 = math.exp %75 : vector<16x64xf32>
    %cst_25 = arith.constant 1.000000e+00 : f32
    %77 = vector.broadcast %cst_25 : f32 to vector<16x64xf32>
    %78 = arith.addf %77, %76 : vector<16x64xf32>
    %79 = arith.divf %77, %78 : vector<16x64xf32>
    %80 = arith.mulf %74, %79 : vector<16x64xf32>
    %81 = arith.truncf %80 : vector<16x64xf32> to vector<16x64xbf16>
    %82 = arith.truncf %32 : vector<16x64xf32> to vector<16x64xbf16>
    %c0_26 = arith.constant 0 : index
    %c0_27 = arith.constant 0 : index
    %83 = vector.load %arg8[%c0_26, %c0_27] : memref<64x128xbf16, #tpu.memory_space<vmem>>, vector<64x128xbf16>
    %cst_28 = arith.constant dense<0.000000e+00> : vector<16x128xf32>
    %84 = tpu.matmul %81, %83, %cst_28 {dimension_numbers = #tpu.dot_dimension_numbers<[1], [0], [0], [1], [0, 0, 1, 1], [], []>} : vector<16x64xbf16>, vector<64x128xbf16>, vector<16x128xf32> -> vector<16x128xf32>
    %c0_29 = arith.constant 0 : index
    %c0_30 = arith.constant 0 : index
    %85 = vector.load %arg9[%c0_29, %c0_30] : memref<1x128xf32, #tpu.memory_space<vmem>>, vector<1x128xf32>
    %86 = vector.broadcast %85 : vector<1x128xf32> to vector<16x128xf32>
    %87 = arith.addf %84, %86 : vector<16x128xf32>
    %c0_31 = arith.constant 0 : index
    %c0_32 = arith.constant 0 : index
    %88 = vector.load %arg10[%c0_31, %c0_32] : memref<64x64xbf16, #tpu.memory_space<vmem>>, vector<64x64xbf16>
    %cst_33 = arith.constant dense<0.000000e+00> : vector<16x64xf32>
    %89 = tpu.matmul %82, %88, %cst_33 {dimension_numbers = #tpu.dot_dimension_numbers<[1], [0], [0], [1], [0, 0, 1, 1], [], []>} : vector<16x64xbf16>, vector<64x64xbf16>, vector<16x64xf32> -> vector<16x64xf32>
    %c0_34 = arith.constant 0 : index
    %c0_35 = arith.constant 0 : index
    %90 = vector.load %arg11[%c0_34, %c0_35] : memref<1x64xf32, #tpu.memory_space<vmem>>, vector<1x64xf32>
    %91 = vector.broadcast %90 : vector<1x64xf32> to vector<16x64xf32>
    %92 = arith.addf %89, %91 : vector<16x64xf32>
    %c0_36 = arith.constant 0 : index
    %c0_37 = arith.constant 0 : index
    %93 = vector.load %arg12[%c0_36, %c0_37] : memref<128x4xf32, #tpu.memory_space<vmem>>, vector<128x4xf32>
    %cst_38 = arith.constant dense<0.000000e+00> : vector<16x4xf32>
    %94 = tpu.matmul %87, %93, %cst_38 {dimension_numbers = #tpu.dot_dimension_numbers<[1], [0], [0], [1], [0, 0, 1, 1], [], []>} : vector<16x128xf32>, vector<128x4xf32>, vector<16x4xf32> -> vector<16x4xf32>
    %c0_39 = arith.constant 0 : index
    %c0_40 = arith.constant 0 : index
    %95 = vector.load %arg13[%c0_39, %c0_40] : memref<64x4xf32, #tpu.memory_space<vmem>>, vector<64x4xf32>
    %cst_41 = arith.constant dense<0.000000e+00> : vector<16x4xf32>
    %96 = tpu.matmul %92, %95, %cst_41 {dimension_numbers = #tpu.dot_dimension_numbers<[1], [0], [0], [1], [0, 0, 1, 1], [], []>} : vector<16x64xf32>, vector<64x4xf32>, vector<16x4xf32> -> vector<16x4xf32>
    %97 = arith.addf %94, %96 : vector<16x4xf32>
    %c0_42 = arith.constant 0 : index
    %c0_43 = arith.constant 0 : index
    %98 = vector.load %arg14[%c0_42, %c0_43] : memref<1x4xf32, #tpu.memory_space<vmem>>, vector<1x4xf32>
    %99 = vector.broadcast %98 : vector<1x4xf32> to vector<16x4xf32>
    %100 = arith.addf %97, %99 : vector<16x4xf32>
    %101 = vector.extract_strided_slice %100 {offsets = [0, 0], sizes = [16, 2], strides = [1, 1]} : vector<16x4xf32> to vector<16x2xf32>
    %102 = vector.extract_strided_slice %100 {offsets = [0, 2], sizes = [16, 2], strides = [1, 1]} : vector<16x4xf32> to vector<16x2xf32>
    %cst_44 = arith.constant 0.000000e+00 : f32
    %103 = vector.broadcast %cst_44 : f32 to vector<16x2xf32>
    %104 = arith.subf %103, %102 : vector<16x2xf32>
    %cst_45 = arith.constant 0.000000e+00 : f32
    %105 = vector.broadcast %cst_45 : f32 to vector<16x2xf32>
    %106 = arith.maximumf %104, %105 : vector<16x2xf32>
    %107 = vector.broadcast %cst_45 : f32 to vector<16x2xf32>
    %108 = arith.subf %104, %107 : vector<16x2xf32>
    %109 = arith.cmpf one, %108, %108 : vector<16x2xf32>
    %110 = vector.broadcast %cst_45 : f32 to vector<16x2xf32>
    %111 = arith.addf %104, %110 : vector<16x2xf32>
    %112 = math.absf %108 : vector<16x2xf32>
    %cst_46 = arith.constant 0.000000e+00 : f32
    %113 = vector.broadcast %cst_46 : f32 to vector<16x2xf32>
    %114 = arith.subf %113, %112 : vector<16x2xf32>
    %115 = math.exp %114 : vector<16x2xf32>
    %116 = math.log1p %115 : vector<16x2xf32>
    %117 = arith.addf %106, %116 : vector<16x2xf32>
    %118 = arith.select %109, %111, %117 : vector<16x2xi1>, vector<16x2xf32>
    %cst_47 = arith.constant 0.000000e+00 : f32
    %119 = vector.broadcast %cst_47 : f32 to vector<16x2xf32>
    %120 = arith.subf %119, %118 : vector<16x2xf32>
    %c1_i32_48 = arith.constant 1 : i32
    %121 = vector.broadcast %c1_i32_48 : i32 to vector<16x1xi32>
    %122 = arith.cmpi sge, %34, %121 : vector<16x1xi32>
    %c1_i32_49 = arith.constant 1 : i32
    %123 = tpu.dynamic_rotate %120 by %c1_i32_49 dim 0 : vector<16x2xf32>, i32 -> vector<16x2xf32>
    %cst_50 = arith.constant 0.000000e+00 : f32
    %124 = vector.shape_cast %122 : vector<16x1xi1> to vector<16x1xi1>
    %125 = vector.broadcast %124 : vector<16x1xi1> to vector<16x2xi1>
    %126 = vector.broadcast %cst_50 : f32 to vector<16x2xf32>
    %127 = arith.select %125, %123, %126 : vector<16x2xi1>, vector<16x2xf32>
    %128 = arith.addf %120, %127 : vector<16x2xf32>
    %c2_i32_51 = arith.constant 2 : i32
    %129 = vector.broadcast %c2_i32_51 : i32 to vector<16x1xi32>
    %130 = arith.cmpi sge, %34, %129 : vector<16x1xi32>
    %c2_i32_52 = arith.constant 2 : i32
    %131 = tpu.dynamic_rotate %128 by %c2_i32_52 dim 0 : vector<16x2xf32>, i32 -> vector<16x2xf32>
    %cst_53 = arith.constant 0.000000e+00 : f32
    %132 = vector.shape_cast %130 : vector<16x1xi1> to vector<16x1xi1>
    %133 = vector.broadcast %132 : vector<16x1xi1> to vector<16x2xi1>
    %134 = vector.broadcast %cst_53 : f32 to vector<16x2xf32>
    %135 = arith.select %133, %131, %134 : vector<16x2xi1>, vector<16x2xf32>
    %136 = arith.addf %128, %135 : vector<16x2xf32>
    %c4_i32 = arith.constant 4 : i32
    %137 = vector.broadcast %c4_i32 : i32 to vector<16x1xi32>
    %138 = arith.cmpi sge, %34, %137 : vector<16x1xi32>
    %c4_i32_54 = arith.constant 4 : i32
    %139 = tpu.dynamic_rotate %136 by %c4_i32_54 dim 0 : vector<16x2xf32>, i32 -> vector<16x2xf32>
    %cst_55 = arith.constant 0.000000e+00 : f32
    %140 = vector.shape_cast %138 : vector<16x1xi1> to vector<16x1xi1>
    %141 = vector.broadcast %140 : vector<16x1xi1> to vector<16x2xi1>
    %142 = vector.broadcast %cst_55 : f32 to vector<16x2xf32>
    %143 = arith.select %141, %139, %142 : vector<16x2xi1>, vector<16x2xf32>
    %144 = arith.addf %136, %143 : vector<16x2xf32>
    %c8_i32 = arith.constant 8 : i32
    %145 = vector.broadcast %c8_i32 : i32 to vector<16x1xi32>
    %146 = arith.cmpi sge, %34, %145 : vector<16x1xi32>
    %c8_i32_56 = arith.constant 8 : i32
    %147 = tpu.dynamic_rotate %144 by %c8_i32_56 dim 0 : vector<16x2xf32>, i32 -> vector<16x2xf32>
    %cst_57 = arith.constant 0.000000e+00 : f32
    %148 = vector.shape_cast %146 : vector<16x1xi1> to vector<16x1xi1>
    %149 = vector.broadcast %148 : vector<16x1xi1> to vector<16x2xi1>
    %150 = vector.broadcast %cst_57 : f32 to vector<16x2xf32>
    %151 = arith.select %149, %147, %150 : vector<16x2xi1>, vector<16x2xf32>
    %152 = arith.addf %144, %151 : vector<16x2xf32>
    %153 = tpu.iota {dimensions = array<i32: 0>} : vector<16x16xi32>
    %154 = tpu.iota {dimensions = array<i32: 1>} : vector<16x16xi32>
    %155 = arith.cmpi sge, %153, %154 : vector<16x16xi32>
    %156 = vector.shape_cast %155 : vector<16x16xi1> to vector<1x16x16xi1>
    %157 = vector.extract_strided_slice %152 {offsets = [0, 0], sizes = [16, 1], strides = [1, 1]} : vector<16x2xf32> to vector<16x1xf32>
    %158 = vector.extract_strided_slice %152 {offsets = [0, 1], sizes = [16, 1], strides = [1, 1]} : vector<16x2xf32> to vector<16x1xf32>
    %159 = vector.shape_cast %157 : vector<16x1xf32> to vector<1x16x1xf32>
    %160 = vector.shape_cast %158 : vector<16x1xf32> to vector<1x16x1xf32>
    %161 = tpu.concatenate %159, %160 in 0 : vector<1x16x1xf32>, vector<1x16x1xf32> -> vector<2x16x1xf32>
    %162 = vector.extract_strided_slice %152 {offsets = [0, 0], sizes = [16, 1], strides = [1, 1]} : vector<16x2xf32> to vector<16x1xf32>
    %163 = tpu.transpose %162, [1, 0] : vector<16x1xf32> -> vector<1x16xf32>
    %164 = vector.extract_strided_slice %152 {offsets = [0, 1], sizes = [16, 1], strides = [1, 1]} : vector<16x2xf32> to vector<16x1xf32>
    %165 = tpu.transpose %164, [1, 0] : vector<16x1xf32> -> vector<1x16xf32>
    %166 = vector.shape_cast %163 : vector<1x16xf32> to vector<1x1x16xf32>
    %167 = vector.shape_cast %165 : vector<1x16xf32> to vector<1x1x16xf32>
    %168 = tpu.concatenate %166, %167 in 0 : vector<1x1x16xf32>, vector<1x1x16xf32> -> vector<2x1x16xf32>
    %169 = vector.extract_strided_slice %101 {offsets = [0, 0], sizes = [16, 1], strides = [1, 1]} : vector<16x2xf32> to vector<16x1xf32>
    %170 = tpu.transpose %169, [1, 0] : vector<16x1xf32> -> vector<1x16xf32>
    %171 = vector.extract_strided_slice %101 {offsets = [0, 1], sizes = [16, 1], strides = [1, 1]} : vector<16x2xf32> to vector<16x1xf32>
    %172 = tpu.transpose %171, [1, 0] : vector<16x1xf32> -> vector<1x16xf32>
    %173 = vector.shape_cast %170 : vector<1x16xf32> to vector<1x1x16xf32>
    %174 = vector.shape_cast %172 : vector<1x16xf32> to vector<1x1x16xf32>
    %175 = tpu.concatenate %173, %174 in 0 : vector<1x1x16xf32>, vector<1x1x16xf32> -> vector<2x1x16xf32>
    %176 = vector.broadcast %161 : vector<2x16x1xf32> to vector<2x16x16xf32>
    %177 = vector.broadcast %168 : vector<2x1x16xf32> to vector<2x16x16xf32>
    %178 = arith.subf %176, %177 : vector<2x16x16xf32>
    %cst_58 = arith.constant 0xFF800000 : f32
    %179 = vector.shape_cast %156 : vector<1x16x16xi1> to vector<1x16x16xi1>
    %180 = vector.broadcast %179 : vector<1x16x16xi1> to vector<2x16x16xi1>
    %181 = vector.broadcast %cst_58 : f32 to vector<2x16x16xf32>
    %182 = arith.select %180, %178, %181 : vector<2x16x16xi1>, vector<2x16x16xf32>
    %183 = vector.broadcast %175 : vector<2x1x16xf32> to vector<2x16x16xf32>
    %184 = arith.addf %182, %183 : vector<2x16x16xf32>
    %cst_59 = arith.constant dense<0xFF800000> : vector<2x16xf32>
    %185 = vector.multi_reduction <maximumf>, %184, %cst_59 [2] : vector<2x16x16xf32> to vector<2x16xf32>
    %186 = vector.shape_cast %185 : vector<2x16xf32> to vector<2x16x1xf32>
    %187 = vector.broadcast %186 : vector<2x16x1xf32> to vector<2x16x16xf32>
    %188 = arith.subf %184, %187 : vector<2x16x16xf32>
    %189 = math.exp %188 : vector<2x16x16xf32>
    %190 = vector.extract_strided_slice %87 {offsets = [0, 0], sizes = [16, 32], strides = [1, 1]} : vector<16x128xf32> to vector<16x32xf32>
    %191 = vector.extract_strided_slice %87 {offsets = [0, 32], sizes = [16, 32], strides = [1, 1]} : vector<16x128xf32> to vector<16x32xf32>
    %192 = vector.shape_cast %190 : vector<16x32xf32> to vector<1x16x32xf32>
    %193 = vector.shape_cast %191 : vector<16x32xf32> to vector<1x16x32xf32>
    %194 = tpu.concatenate %192, %193 in 0 : vector<1x16x32xf32>, vector<1x16x32xf32> -> vector<2x16x32xf32>
    %195 = arith.truncf %194 : vector<2x16x32xf32> to vector<2x16x32xbf16>
    %196 = vector.extract_strided_slice %87 {offsets = [0, 64], sizes = [16, 32], strides = [1, 1]} : vector<16x128xf32> to vector<16x32xf32>
    %197 = vector.extract_strided_slice %87 {offsets = [0, 96], sizes = [16, 32], strides = [1, 1]} : vector<16x128xf32> to vector<16x32xf32>
    %198 = vector.shape_cast %196 : vector<16x32xf32> to vector<1x16x32xf32>
    %199 = vector.shape_cast %197 : vector<16x32xf32> to vector<1x16x32xf32>
    %200 = tpu.concatenate %198, %199 in 0 : vector<1x16x32xf32>, vector<1x16x32xf32> -> vector<2x16x32xf32>
    %201 = arith.truncf %200 : vector<2x16x32xf32> to vector<2x16x32xbf16>
    %202 = vector.extract_strided_slice %92 {offsets = [0, 0], sizes = [16, 32], strides = [1, 1]} : vector<16x64xf32> to vector<16x32xf32>
    %203 = vector.extract_strided_slice %92 {offsets = [0, 32], sizes = [16, 32], strides = [1, 1]} : vector<16x64xf32> to vector<16x32xf32>
    %204 = vector.shape_cast %202 : vector<16x32xf32> to vector<1x16x32xf32>
    %205 = vector.shape_cast %203 : vector<16x32xf32> to vector<1x16x32xf32>
    %206 = tpu.concatenate %204, %205 in 0 : vector<1x16x32xf32>, vector<1x16x32xf32> -> vector<2x16x32xf32>
    %207 = arith.truncf %206 : vector<2x16x32xf32> to vector<2x16x32xbf16>
    "tpu.trace_start"() <{level = 10 : i32, message = "hqd,hkd->hqk"}> : () -> ()
    %cst_60 = arith.constant dense<0.000000e+00> : vector<2x16x16xf32>
    %208 = tpu.matmul %195, %201, %cst_60 {dimension_numbers = #tpu.dot_dimension_numbers<[2], [2], [1], [1], [0, 0, 0, 1, 1, 1], [0], [0]>} : vector<2x16x32xbf16>, vector<2x16x32xbf16>, vector<2x16x16xf32> -> vector<2x16x16xf32>
    "tpu.trace_stop"() : () -> ()
    %209 = arith.mulf %208, %189 : vector<2x16x16xf32>
    %cst_61 = arith.constant dense<0.000000e+00> : vector<2x16xf32>
    %210 = vector.multi_reduction <add>, %209, %cst_61 [2] : vector<2x16x16xf32> to vector<2x16xf32>
    %211 = vector.shape_cast %210 : vector<2x16xf32> to vector<2x16x1xf32>
    %212 = math.absf %211 : vector<2x16x1xf32>
    %cst_62 = arith.constant 0.000000e+00 : f32
    %213 = vector.broadcast %cst_62 : f32 to vector<2x16x1xf32>
    %214 = arith.subf %213, %186 : vector<2x16x1xf32>
    %215 = math.exp %214 : vector<2x16x1xf32>
    %216 = arith.maximumf %212, %215 : vector<2x16x1xf32>
    %cst_63 = arith.constant 9.99999997E-7 : f32
    %217 = vector.broadcast %cst_63 : f32 to vector<2x16x1xf32>
    %218 = arith.addf %216, %217 : vector<2x16x1xf32>
    %219 = tpu.reciprocal %218 {approx = true} : vector<2x16x1xf32> -> vector<2x16x1xf32>
    %220 = vector.broadcast %219 : vector<2x16x1xf32> to vector<2x16x16xf32>
    %221 = arith.mulf %209, %220 : vector<2x16x16xf32>
    %222 = arith.truncf %221 : vector<2x16x16xf32> to vector<2x16x16xbf16>
    "tpu.trace_start"() <{level = 10 : i32, message = "hqk,hkd->hqd"}> : () -> ()
    %cst_64 = arith.constant dense<0.000000e+00> : vector<2x16x32xf32>
    %223 = tpu.matmul %222, %207, %cst_64 {dimension_numbers = #tpu.dot_dimension_numbers<[2], [1], [1], [2], [0, 0, 0, 1, 1, 2], [0], [0]>} : vector<2x16x16xbf16>, vector<2x16x32xbf16>, vector<2x16x32xf32> -> vector<2x16x32xf32>
    "tpu.trace_stop"() : () -> ()
    %cst_65 = arith.constant dense<0.000000e+00> : vector<2x16xf32>
    %224 = vector.multi_reduction <add>, %223, %cst_65 [2] : vector<2x16x32xf32> to vector<2x16xf32>
    %225 = vector.shape_cast %224 : vector<2x16xf32> to vector<2x16x1xf32>
    %cst_66 = arith.constant 3.200000e+01 : f32
    %226 = vector.broadcast %cst_66 : f32 to vector<2x16x1xf32>
    %227 = arith.divf %225, %226 : vector<2x16x1xf32>
    %228 = vector.broadcast %227 : vector<2x16x1xf32> to vector<2x16x32xf32>
    %229 = arith.subf %223, %228 : vector<2x16x32xf32>
    %230 = arith.mulf %229, %229 : vector<2x16x32xf32>
    %cst_67 = arith.constant dense<0.000000e+00> : vector<2x16xf32>
    %231 = vector.multi_reduction <add>, %230, %cst_67 [2] : vector<2x16x32xf32> to vector<2x16xf32>
    %232 = vector.shape_cast %231 : vector<2x16xf32> to vector<2x16x1xf32>
    %cst_68 = arith.constant 3.200000e+01 : f32
    %233 = vector.broadcast %cst_68 : f32 to vector<2x16x1xf32>
    %234 = arith.divf %232, %233 : vector<2x16x1xf32>
    %235 = vector.broadcast %227 : vector<2x16x1xf32> to vector<2x16x32xf32>
    %236 = arith.subf %223, %235 : vector<2x16x32xf32>
    %cst_69 = arith.constant 9.99999974E-6 : f32
    %237 = vector.broadcast %cst_69 : f32 to vector<2x16x1xf32>
    %238 = arith.addf %234, %237 : vector<2x16x1xf32>
    %239 = math.rsqrt %238 : vector<2x16x1xf32>
    %240 = vector.broadcast %239 : vector<2x16x1xf32> to vector<2x16x32xf32>
    %241 = arith.mulf %236, %240 : vector<2x16x32xf32>
    %c0_70 = arith.constant 0 : index
    %c0_71 = arith.constant 0 : index
    %242 = vector.load %arg15[%c0_70, %c0_71] : memref<2x32xf32, #tpu.memory_space<vmem>>, vector<2x32xf32>
    %243 = vector.extract_strided_slice %241 {offsets = [0, 0, 0], sizes = [1, 16, 32], strides = [1, 1, 1]} : vector<2x16x32xf32> to vector<1x16x32xf32>
    %244 = vector.shape_cast %243 : vector<1x16x32xf32> to vector<16x32xf32>
    %245 = vector.extract_strided_slice %242 {offsets = [0, 0], sizes = [1, 32], strides = [1, 1]} : vector<2x32xf32> to vector<1x32xf32>
    %246 = vector.broadcast %245 : vector<1x32xf32> to vector<16x32xf32>
    %247 = arith.mulf %244, %246 : vector<16x32xf32>
    %c0_72 = arith.constant 0 : index
    %c0_73 = arith.constant 0 : index
    %248 = vector.load %arg20[%c0_72, %c0_73] : memref<16x64xf32, #tpu.memory_space<vmem>>, vector<16x32xf32>
    tpu.vector_store %arg20[%c0_72, %c0_73], %247 {strides = array<i32>} : memref<16x64xf32, #tpu.memory_space<vmem>>, vector<16x32xf32>,
    %249 = vector.extract_strided_slice %241 {offsets = [1, 0, 0], sizes = [1, 16, 32], strides = [1, 1, 1]} : vector<2x16x32xf32> to vector<1x16x32xf32>
    %250 = vector.shape_cast %249 : vector<1x16x32xf32> to vector<16x32xf32>
    %251 = vector.extract_strided_slice %242 {offsets = [1, 0], sizes = [1, 32], strides = [1, 1]} : vector<2x32xf32> to vector<1x32xf32>
    %252 = vector.broadcast %251 : vector<1x32xf32> to vector<16x32xf32>
    %253 = arith.mulf %250, %252 : vector<16x32xf32>
    %c0_74 = arith.constant 0 : index
    %c32 = arith.constant 32 : index
    %254 = vector.load %arg20[%c0_74, %c32] : memref<16x64xf32, #tpu.memory_space<vmem>>, vector<16x32xf32>
    tpu.vector_store %arg20[%c0_74, %c32], %253 {strides = array<i32>} : memref<16x64xf32, #tpu.memory_space<vmem>>, vector<16x32xf32>,
    %c0_75 = arith.constant 0 : index
    %c0_76 = arith.constant 0 : index
    %255 = vector.load %arg20[%c0_75, %c0_76] : memref<16x64xf32, #tpu.memory_space<vmem>>, vector<16x64xf32>
    %c0_77 = arith.constant 0 : index
    %c0_78 = arith.constant 0 : index
    %256 = vector.load %arg16[%c0_77, %c0_78] : memref<1x64xf32, #tpu.memory_space<vmem>>, vector<1x64xf32>
    %257 = vector.broadcast %256 : vector<1x64xf32> to vector<16x64xf32>
    %258 = arith.mulf %257, %80 : vector<16x64xf32>
    %259 = arith.addf %255, %258 : vector<16x64xf32>
    %260 = arith.negf %33 : vector<16x64xf32>
    %261 = math.exp %260 : vector<16x64xf32>
    %cst_79 = arith.constant 1.000000e+00 : f32
    %262 = vector.broadcast %cst_79 : f32 to vector<16x64xf32>
    %263 = arith.addf %262, %261 : vector<16x64xf32>
    %264 = arith.divf %262, %263 : vector<16x64xf32>
    %265 = arith.mulf %33, %264 : vector<16x64xf32>
    %266 = arith.mulf %259, %265 : vector<16x64xf32>
    %267 = arith.truncf %266 : vector<16x64xf32> to vector<16x64xbf16>
    %c0_80 = arith.constant 0 : index
    %c0_81 = arith.constant 0 : index
    %268 = vector.load %arg17[%c0_80, %c0_81] : memref<64x32xbf16, #tpu.memory_space<vmem>>, vector<64x32xbf16>
    %cst_82 = arith.constant dense<0.000000e+00> : vector<16x32xf32>
    %269 = tpu.matmul %267, %268, %cst_82 {dimension_numbers = #tpu.dot_dimension_numbers<[1], [0], [0], [1], [0, 0, 1, 1], [], []>} : vector<16x64xbf16>, vector<64x32xbf16>, vector<16x32xf32> -> vector<16x32xf32>
    %c0_83 = arith.constant 0 : index
    %c0_84 = arith.constant 0 : index
    %270 = vector.load %arg18[%c0_83, %c0_84] : memref<1x32xf32, #tpu.memory_space<vmem>>, vector<1x32xf32>
    %271 = vector.broadcast %270 : vector<1x32xf32> to vector<16x32xf32>
    %272 = arith.addf %269, %271 : vector<16x32xf32>
    %273 = arith.addf %1, %272 : vector<16x32xf32>
    %c0_85 = arith.constant 0 : index
    %c0_86 = arith.constant 0 : index
    %c0_87 = arith.constant 0 : index
    %274 = vector.load %arg19[%c0_85, %c0_86, %c0_87] : memref<1x16x32xf32, #tpu.memory_space<vmem>>, vector<1x16x32xf32>
    %275 = vector.shape_cast %274 : vector<1x16x32xf32> to vector<16x32xf32>
    %276 = vector.shape_cast %273 : vector<16x32xf32> to vector<1x16x32xf32>
    tpu.vector_store %arg19[%c0_85, %c0_86, %c0_87], %276 {strides = array<i32>} : memref<1x16x32xf32, #tpu.memory_space<vmem>>, vector<1x16x32xf32>,
    return
  }
  func.func @transform_0(%arg0: i32) -> (i32, i32, i32) {
    %c0_i32 = arith.constant 0 : i32
    %c0_i32_0 = arith.constant 0 : i32
    %c0_i32_1 = arith.constant 0 : i32
    return %arg0, %c0_i32, %c0_i32_0 : i32, i32, i32
  }
  func.func @transform_1(%arg0: i32) -> (i32, i32) {
    %c0_i32 = arith.constant 0 : i32
    %c0_i32_0 = arith.constant 0 : i32
    %c0_i32_1 = arith.constant 0 : i32
    return %c0_i32, %c0_i32_0 : i32, i32
  }
  func.func @transform_2(%arg0: i32) -> (i32, i32) {
    %c0_i32 = arith.constant 0 : i32
    %c0_i32_0 = arith.constant 0 : i32
    %c0_i32_1 = arith.constant 0 : i32
    return %c0_i32, %c0_i32_0 : i32, i32
  }
  func.func @transform_3(%arg0: i32) -> (i32, i32) {
    %c0_i32 = arith.constant 0 : i32
    %c0_i32_0 = arith.constant 0 : i32
    %c0_i32_1 = arith.constant 0 : i32
    return %c0_i32, %c0_i32_0 : i32, i32
  }
  func.func @transform_4(%arg0: i32) -> (i32, i32) {
    %c0_i32 = arith.constant 0 : i32
    %c0_i32_0 = arith.constant 0 : i32
    %c0_i32_1 = arith.constant 0 : i32
    return %c0_i32, %c0_i32_0 : i32, i32
  }
  func.func @transform_5(%arg0: i32) -> (i32, i32) {
    %c0_i32 = arith.constant 0 : i32
    %c0_i32_0 = arith.constant 0 : i32
    %c0_i32_1 = arith.constant 0 : i32
    return %c0_i32, %c0_i32_0 : i32, i32
  }
  func.func @transform_6(%arg0: i32) -> (i32, i32) {
    %c0_i32 = arith.constant 0 : i32
    %c0_i32_0 = arith.constant 0 : i32
    %c0_i32_1 = arith.constant 0 : i32
    return %c0_i32, %c0_i32_0 : i32, i32
  }
  func.func @transform_7(%arg0: i32) -> (i32, i32) {
    %c0_i32 = arith.constant 0 : i32
    %c0_i32_0 = arith.constant 0 : i32
    %c0_i32_1 = arith.constant 0 : i32
    return %c0_i32, %c0_i32_0 : i32, i32
  }
  func.func @transform_8(%arg0: i32) -> (i32, i32) {
    %c0_i32 = arith.constant 0 : i32
    %c0_i32_0 = arith.constant 0 : i32
    %c0_i32_1 = arith.constant 0 : i32
    return %c0_i32, %c0_i32_0 : i32, i32
  }
  func.func @transform_9(%arg0: i32) -> (i32, i32) {
    %c0_i32 = arith.constant 0 : i32
    %c0_i32_0 = arith.constant 0 : i32
    %c0_i32_1 = arith.constant 0 : i32
    return %c0_i32, %c0_i32_0 : i32, i32
  }
  func.func @transform_10(%arg0: i32) -> (i32, i32) {
    %c0_i32 = arith.constant 0 : i32
    %c0_i32_0 = arith.constant 0 : i32
    %c0_i32_1 = arith.constant 0 : i32
    return %c0_i32, %c0_i32_0 : i32, i32
  }
  func.func @transform_11(%arg0: i32) -> (i32, i32) {
    %c0_i32 = arith.constant 0 : i32
    %c0_i32_0 = arith.constant 0 : i32
    %c0_i32_1 = arith.constant 0 : i32
    return %c0_i32, %c0_i32_0 : i32, i32
  }
  func.func @transform_12(%arg0: i32) -> (i32, i32) {
    %c0_i32 = arith.constant 0 : i32
    %c0_i32_0 = arith.constant 0 : i32
    %c0_i32_1 = arith.constant 0 : i32
    return %c0_i32, %c0_i32_0 : i32, i32
  }
  func.func @transform_13(%arg0: i32) -> (i32, i32) {
    %c0_i32 = arith.constant 0 : i32
    %c0_i32_0 = arith.constant 0 : i32
    %c0_i32_1 = arith.constant 0 : i32
    return %c0_i32, %c0_i32_0 : i32, i32
  }
  func.func @transform_14(%arg0: i32) -> (i32, i32) {
    %c0_i32 = arith.constant 0 : i32
    %c0_i32_0 = arith.constant 0 : i32
    %c0_i32_1 = arith.constant 0 : i32
    return %c0_i32, %c0_i32_0 : i32, i32
  }
  func.func @transform_15(%arg0: i32) -> (i32, i32) {
    %c0_i32 = arith.constant 0 : i32
    %c0_i32_0 = arith.constant 0 : i32
    %c0_i32_1 = arith.constant 0 : i32
    return %c0_i32, %c0_i32_0 : i32, i32
  }
  func.func @transform_16(%arg0: i32) -> (i32, i32) {
    %c0_i32 = arith.constant 0 : i32
    %c0_i32_0 = arith.constant 0 : i32
    %c0_i32_1 = arith.constant 0 : i32
    return %c0_i32, %c0_i32_0 : i32, i32
  }
  func.func @transform_17(%arg0: i32) -> (i32, i32) {
    %c0_i32 = arith.constant 0 : i32
    %c0_i32_0 = arith.constant 0 : i32
    %c0_i32_1 = arith.constant 0 : i32
    return %c0_i32, %c0_i32_0 : i32, i32
  }
  func.func @transform_18(%arg0: i32) -> (i32, i32, i32) {
    %c0_i32 = arith.constant 0 : i32
    %c0_i32_0 = arith.constant 0 : i32
    %c0_i32_1 = arith.constant 0 : i32
    return %arg0, %c0_i32, %c0_i32_0 : i32, i32, i32
  }
}

</mosaic_0001>

<bundles_post_ra>
// kernel: mlstm_wrapper_forward.5
= control target key start
LH: loop header
LB: loop body
LE: loop exit
PB: predicated region body
PF: predicated region fallthrough
CT: control target
= control target key end

     0   :  { %s331_s12 = smov 0   ;;  %s367_s0 = inlined_call_operand.vmem [shape: f32[2,16,32], index: 0, kind: input, shape index: {}]   ;;  %s368_s1 = inlined_call_operand.vmem [shape: f32[1,32], index: 1, kind: input, shape index: {}]   ;;  %s369_s2 = inlined_call_operand.vmem [shape: f32[1,32], index: 2, kind: input, shape index: {}]   ;;  %s370_s3 = inlined_call_operand.vmem [shape: f32[2,16,32], index: 3, kind: output, shape index: {}]  }
   0x1 LB: > { %s276_s13 = sadd.s32 4294967295, %s309_s12   ;;  %p280_p0 = scmp.ge.s32.totalorder %s309_s12, 1  ;;  %s309_s12 = sphi %s331_s12, %s13_s12  }
   0x2   : > { %p137_p1 = scmp.lt.s32.totalorder %s309_s12, 3 }
   0x4   : > { %p138_p2 = pnand %p280_p0, %p137_p1 }
   0x5   : > { %p161_p3 = scmp.lt.s32.totalorder (!%p138_p2), %s276_s13, 1 }
   0x6   : > { %141 = sbr.rel (%p138_p2) target bundleno = 328 (0x148), region = 32 }
   0xb   : > { %s372_s13 = smov (!%p161_p3, %s276_s13), 1  ;;  %vm173_vm0 = vcmask 261120   ;;  %v285_v21 = vld [vmem:[%s368_s1] ss:$0 sm:$0xff] }
   0xc   : > { %s289_s14 = sshll.u32 %s372_s13, 4  ;;  %v286_v23 = vld [vmem:[%s369_s2] ss:$0 sm:$0xff] }
   0xd   : > { %s165_s17 = scalar_lea.vmem %s367_s0, %s289_s14  ;;  %s170_s24 = scalar_lea.vmem %s370_s3, %s289_s14 }
   0xe   : > { %v171_v0 = vld [vmem:[%s165_s17] sm:$0xff]  ;;  %v172_v1 = vld [vmem:[%s165_s17 + $0x8] sm:$0xff] }
   0xf   : > { %v174_v2 = vsel %vm173_vm0, %v171_v0, 0.0  ;;  %v177_v3 = vsel %vm173_vm0, %v172_v1, 0.0 }
  0x10   : > { %175 = vadd.xlane.f32.xlu0 %v174_v2 }
  0x14   : > { %178 = vadd.xlane.f32.xlu0 %v177_v3 }
  0x99   : > { %v176_v4 = vpop.xlane.xlu0 %175 }
  0x9a   : > { %v181_v5 = vmul.f32 0.03125, %v176_v4 }
  0x9c   : > { %v183_v6 = vsub.f32 %v171_v0, %v181_v5 }
  0x9d   : > { %v179_v7 = vpop.xlane.xlu0 %178 }
  0x9e   : > { %v182_v8 = vmul.f32 0.03125, %v179_v7  ;;  %v185_v9 = vmul.f32 %v183_v6, %v183_v6 }
  0xa0   : > { %v184_v10 = vsub.f32 %v172_v1, %v182_v8  ;;  %v187_v11 = vsel %vm173_vm0, %v185_v9, 0.0 }
  0xa1   : > { %188 = vadd.xlane.f32.xlu1 %v187_v11 }
  0xa2   : > { %v186_v12 = vmul.f32 %v184_v10, %v184_v10 }
  0xa4   : > { %v190_v13 = vsel %vm173_vm0, %v186_v12, 0.0 }
  0xa5   : > { %191 = vadd.xlane.f32.xlu1 %v190_v13 }
 0x12a   : > { %v189_v14 = vpop.xlane.xlu1 %188 }
 0x12b   : > { %v193_v15 = vmul.f32 0.03125, %v189_v14 }
 0x12d   : > { %v195_v16 = vadd.f32 1e-05, %v193_v15 }
 0x12e   : > { %v192_v17 = vpop.xlane.xlu1 %191 }
 0x12f   : > { %299 = vrsqrt.f32 %v195_v16  ;;  %v194_v18 = vmul.f32 0.03125, %v192_v17 }
 0x131   : > { %v196_v19 = vadd.f32 1e-05, %v194_v18 }
 0x133   : > { %301 = vrsqrt.f32 %v196_v19 }
 0x13c   : > { %v300_v20 = vpop.eup %299 }
 0x13d   : > { %v199_v22 = vmul.f32 %v300_v20, %v183_v6 }
 0x13f   : > { %v208_v24 = vmul.f32 %v285_v21, %v199_v22 }
 0x140   : > { %v302_v25 = vpop.eup %301 }
 0x141   : > { %v217_v26 = vadd.f32 %v286_v23, %v208_v24  ;;  %v200_v27 = vmul.f32 %v302_v25, %v184_v10 }
 0x143   : > { %219 = vst.msk [vmem:[%s170_s24] sm:$0xff] %vm173_vm0, %v217_v26  ;;  %v209_v28 = vmul.f32 %v285_v21, %v200_v27 }
 0x145   : > { %v218_v29 = vadd.f32 %v286_v23, %v209_v28 }
 0x147   : > { %220 = vst.msk [vmem:[%s170_s24 + $0x8] sm:$0xff] %vm173_vm0, %v218_v29 }
 0x148 PF: > { %s13_s12 = sadd.s32 1, %s309_s12  }
 0x149   : > { %p10_p4 = scmp.ge.s32.totalorder %s13_s12, 4  }
 0x14b   :  { %12 = sbr.rel (!%p10_p4) target bundleno = 1 (0x1), region = 62 }

// kernel: mlstm_wrapper_forward.3
= control target key start
LH: loop header
LB: loop body
LE: loop exit
PB: predicated region body
PF: predicated region fallthrough
CT: control target
= control target key end

     0   :  { %s2482_s27 = smov 0   ;;  %s2915_s0 = inlined_call_operand.vmem [shape: f32[2,16,32], index: 0, kind: input, shape index: {}]   ;;  %s2916_s1 = inlined_call_operand.vmem [shape: f32[1,32], index: 1, kind: input, shape index: {}]   ;;  %s2917_s2 = inlined_call_operand.vmem [shape: f32[1,32], index: 2, kind: input, shape index: {}]   ;;  %s2918_s3 = inlined_call_operand.vmem [shape: bf16[32,128], index: 3, kind: input, shape index: {}]   ;;  %s2919_s4 = inlined_call_operand.vmem [shape: f32[1,128], index: 4, kind: input, shape index: {}]   ;;  %s2920_s5 = inlined_call_operand.vmem [shape: f32[4,64], index: 5, kind: input, shape index: {}]   ;;  %s2921_s6 = inlined_call_operand.vmem [shape: f32[1,64], index: 6, kind: input, shape index: {}]   ;;  %s2922_s7 = inlined_call_operand.vmem [shape: bf16[64,128], index: 7, kind: input, shape index: {}]   ;;  %s2923_s8 = inlined_call_operand.vmem [shape: f32[1,128], index: 8, kind: input, shape index: {}]   ;;  %s2924_s9 = inlined_call_operand.vmem [shape: bf16[64,64], index: 9, kind: input, shape index: {}]   ;;  %s2925_s10 = inlined_call_operand.vmem [shape: f32[1,64], index: 10, kind: input, shape index: {}]   ;;  %s2926_s11 = inlined_call_operand.vmem [shape: f32[128,4], index: 11, kind: input, shape index: {}]   ;;  %s2927_s12 = inlined_call_operand.vmem [shape: f32[64,4], index: 12, kind: input, shape index: {}]   ;;  %s2928_s13 = inlined_call_operand.vmem [shape: f32[1,4], index: 13, kind: input, shape index: {}]   ;;  %s2929_s14 = inlined_call_operand.vmem [shape: f32[2,32], index: 14, kind: input, shape index: {}]   ;;  %s2930_s15 = inlined_call_operand.vmem [shape: f32[1,64], index: 15, kind: input, shape index: {}]   ;;  %s2931_s16 = inlined_call_operand.vmem [shape: bf16[64,32], index: 16, kind: input, shape index: {}]   ;;  %s2932_s17 = inlined_call_operand.vmem [shape: f32[1,32], index: 17, kind: input, shape index: {}]   ;;  %s2933_s18 = inlined_call_operand.vmem [shape: f32[2,16,32], index: 18, kind: output, shape index: {}]  }
   0x1   :  { %2934 = sst [smem:[#allocation3_spill]] %s2915_s0 }
   0x2   :  { %2935 = sst [smem:[#allocation4_spill]] %s2916_s1 }
   0x3   :  { %2936 = sst [smem:[#allocation5_spill]] %s2917_s2 }
   0x4 LB: > { %s2037_s28 = sadd.s32 4294967295, %s2375_s27   ;;  %p2041_p0 = scmp.ge.s32.totalorder %s2375_s27, 1  ;;  %s2375_s27 = sphi %s2482_s27, %s28_s27  }
   0x5   : > { %p512_p1 = scmp.lt.s32.totalorder %s2375_s27, 3 }
   0x7   : > { %p513_p2 = pnand %p2041_p0, %p512_p1 }
   0x8   : > { %p566_p3 = scmp.lt.s32.totalorder (!%p513_p2), %s2037_s28, 1  ;;  %s2937_s19 = sld [smem:[#allocation3_spill]] (!%p513_p2) }
   0x9   : > { %516 = sbr.rel (%p513_p2) target bundleno = 3422 (0xd5e), region = 92  ;;  %s2938_s25 = sld [smem:[#allocation4_spill]] (!%p513_p2) }
   0xa   : > { %s2939_s0 = sld [smem:[#allocation5_spill]] (!%p513_p2)  ;;  %s2381_s20 = smov (!%p513_p2), 96  }
   0xb   : > { %s2383_s21 = smov (!%p513_p2), 64   ;;  %s2384_s22 = smov (!%p513_p2), 127  }
   0xc   : > { %s2385_s2 = smov (!%p513_p2), 125  }
   0xe   : > { %s2941_s28 = smov (!%p566_p3, %s2037_s28), 1  ;;  %vm579_vm0 = vcmask 261120   ;;  %v2293_v14 = vld [vmem:[%s2918_s3 + $0x8] sm:$0xff]   ;;  %v2377_v15 = vmov 0.0   ;;  %vm2378_vm1 = vmmov 0   ;;  %v2294_v16 = vld [vmem:[%s2918_s3] sm:$0xff]   ;;  %v693_v43 = vlaneseq }
   0xf   : > { %s2085_s29 = sshll.u32 %s2941_s28, 4  ;;  %2141 = vmatprep.subr.bf16.mxu0 %v2377_v15  ;;  %2145 = vmatprep.mubr.msk.bf16.mxu0 %vm2378_vm1, %v2377_v15  ;;  %v2046_v25 = vld [vmem:[%s2938_s25] ss:$0 sm:$0xff]  ;;  %v2295_v33 = vld [vmem:[%s2924_s9 + $0x18] sm:$0xff]   ;;  %v2296_v35 = vld [vmem:[%s2924_s9 + $0x10] sm:$0xff]   ;;  %vm830_vm2 = vcmask 523264  }
  0x10   : > { %s2498_s1 = scalar_lea.vmem %s2937_s19, %s2085_s29  ;;  %2142 = vmatpush3.bf16.msra.mxu0 %v2293_v14  ;;  %2149 = vmatprep.subr.bf16.mxu1 %v2377_v15  ;;  %v2047_v29 = vld [vmem:[%s2939_s0] ss:$0 sm:$0xff]  ;;  %v2297_v36 = vld [vmem:[%s2924_s9 + $0x8] sm:$0xff]   ;;  %v2299_v38 = vld [vmem:[%s2922_s7 + $0x18] sm:$0xff]   ;;  %v2566_v44 = vshrl.u32 %v693_v43, 7  ;;  %s2379_s0 = smov 126  }
  0x11   : > { %v577_v0 = vld [vmem:[%s2498_s1] sm:$0xff]  ;;  %v578_v1 = vld [vmem:[%s2498_s1 + $0x8] sm:$0xff]  ;;  %2143 = vmatprep.subr.bf16.mxu0 %v2377_v15  ;;  %2157 = vmatprep.mubr.msk.bf16.mxu1 %vm2378_vm1, %v2377_v15  ;;  %v2300_v39 = vld [vmem:[%s2922_s7 + $0x10] sm:$0xff]   ;;  %s2380_s19 = smov 2  }
  0x12   : > { %v580_v2 = vsel %vm579_vm0, %v577_v0, 0.0  ;;  %v583_v3 = vsel %vm579_vm0, %v578_v1, 0.0  ;;  %v2298_v37 = vld [vmem:[%s2924_s9] sm:$0xff]   ;;  %2150 = vmatpush3.bf16.msra.mxu1 %v2299_v38  ;;  %v2301_v40 = vld [vmem:[%s2922_s7 + $0x8] sm:$0xff]   ;;  %v2562_v42 = vld [vmem:[%s2927_s12 + $0x38] sm:$0xff]  ;;  %v699_v47 = vsub.s32 3, %v2566_v44 }
  0x13   : > { %581 = vadd.xlane.f32.xlu0 %v580_v2  ;;  %2151 = vmatprep.subr.bf16.mxu1 %v2377_v15  ;;  %v2302_v41 = vld [vmem:[%s2922_s7] sm:$0xff]   ;;  %v2576_v49 = vsub.s32 0, %v2566_v44  ;;  %v739_v50 = vsub.s32 1, %v2566_v44  ;;  %vm707_vm3 = vcmp.lt.s32.totalorder %v2566_v44, 3  ;;  %v760_v55 = vsub.s32 2, %v2566_v44 }
  0x14   : > { %2144 = vmatpush3.bf16.msra.mxu0 %v2294_v16  ;;  %v2048_v45 = vld [vmem:[%s2919_s4] ss:$0 sm:$0xff]  ;;  %vm728_vm4 = vcmp.lt.s32.totalorder %v2566_v44, 2  ;;  %vm703_vm5 = vcmp.ge.s32.totalorder %v2566_v44, 3  ;;  %vm724_vm6 = vcmp.ge.s32.totalorder %v2566_v44, 2  ;;  %vm745_vm7 = vcmp.ge.s32.totalorder %v2566_v44, 1 }
  0x15   : > { %2161 = vmatprep.subr.bf16.mxu0 %v2377_v15  ;;  %v696_v48 = vld [vmem:[%s2920_s5] sm:$0xf]  ;;  %vm749_vm8 = vcmp.lt.s32.totalorder %v2566_v44, 1  ;;  %vm1247_vm13 = vcmp.lt.s32.totalorder %v2566_v44, 4  ;;  %vm1235_vm14 = vcmp.ge.s32.totalorder %v2566_v44, 4 }
  0x16   : > { %2152 = vmatpush3.bf16.msra.mxu1 %v2300_v39  ;;  %v700_v54 = vrot.slane %v696_v48, %v699_v47  ;;  %v719_v57 = vrot.slane %v696_v48, %v2576_v49  ;;  %v740_v58 = vrot.slane %v696_v48, %v739_v50  ;;  %v978_v47 = vld [vmem:[%s2927_s12 + $0x20] sm:$0xff] }
  0x17   : > { %584 = vadd.xlane.f32.xlu0 %v583_v3  ;;  %2153 = vmatprep.subr.bf16.mxu1 %v2377_v15  ;;  %v761_v3 = vrot.slane %v696_v48, %v760_v55  ;;  %v977_v48 = vld [vmem:[%s2927_s12 + $0x18] sm:$0xff]  ;;  %v972_v55 = vld [vmem:[%s2926_s11 + $0x70] sm:$0xff] }
  0x1a   : > { %2154 = vmatpush3.bf16.msra.mxu1 %v2301_v40 }
  0x1b   : > { %2155 = vmatprep.subr.bf16.mxu1 %v2377_v15 }
  0x1e   : > { %2156 = vmatpush3.bf16.msra.mxu1 %v2302_v41 }
  0x1f   : > { %2173 = vmatprep.subr.mxu1 %v2562_v42 }
  0x9c   : > { %v582_v4 = vpop.xlane.xlu0 %581 }
  0x9d   : > { %v587_v5 = vmul.f32 0.03125, %v582_v4 }
  0x9f   : > { %v589_v6 = vsub.f32 %v577_v0, %v587_v5 }
  0xa0   : > { %v585_v7 = vpop.xlane.xlu0 %584 }
  0xa1   : > { %v588_v8 = vmul.f32 0.03125, %v585_v7  ;;  %v591_v9 = vmul.f32 %v589_v6, %v589_v6 }
  0xa3   : > { %v590_v10 = vsub.f32 %v578_v1, %v588_v8  ;;  %v593_v11 = vsel %vm579_vm0, %v591_v9, 0.0 }
  0xa4   : > { %594 = vadd.xlane.f32.xlu1 %v593_v11 }
  0xa5   : > { %v592_v12 = vmul.f32 %v590_v10, %v590_v10 }
  0xa7   : > { %v596_v13 = vsel %vm579_vm0, %v592_v12, 0.0 }
  0xa8   : > { %597 = vadd.xlane.f32.xlu1 %v596_v13 }
 0x12d   : > { %v595_v17 = vpop.xlane.xlu1 %594 }
 0x12e   : > { %v599_v18 = vmul.f32 0.03125, %v595_v17 }
 0x130   : > { %v601_v19 = vadd.f32 1e-05, %v599_v18 }
 0x131   : > { %v598_v20 = vpop.xlane.xlu1 %597 }
 0x132   : > { %2307 = vrsqrt.f32 %v601_v19  ;;  %v600_v21 = vmul.f32 0.03125, %v598_v20 }
 0x134   : > { %v602_v22 = vadd.f32 1e-05, %v600_v21 }
 0x136   : > { %2309 = vrsqrt.f32 %v602_v22 }
 0x13f   : > { %v2308_v23 = vpop.eup %2307 }
 0x140   : > { %v605_v24 = vmul.f32 %v2308_v23, %v589_v6 }
 0x142   : > { %v614_v28 = vmul.f32 %v2046_v25, %v605_v24 }
 0x143   : > { %v2310_v26 = vpop.eup %2309 }
 0x144   : > { %v606_v27 = vmul.f32 %v2310_v26, %v590_v10  ;;  %v623_v31 = vadd.f32 %v2047_v29, %v614_v28  ;;  %v2052_v26 = vld [vmem:[%s2921_s6] ss:$0 sm:$0xff] }
 0x146   : > { %v615_v30 = vmul.f32 %v2046_v25, %v606_v27 }
 0x148   : > { %v624_v32 = vadd.f32 %v2047_v29, %v615_v30 }
 0x14a   : > { %v625_v34 = vpack.c.bf16 %v624_v32, %v623_v31 }
 0x14c   : > { %2146 = vmatmul.mubr.msk.bf16.vlgmr.msra.gmra.mxu0 %vm579_vm0, %v625_v34 }
 0x14d   : > { %2162 = vmatpush3.bf16.msra.mxu0 %v2295_v33  ;;  %2169 = vmatprep.mubr.msk.bf16.mxu0 %vm2378_vm1, %v2377_v15 }
 0x14e   : > { %2163 = vmatprep.subr.bf16.mxu0 %v2377_v15 }
 0x151   : > { %2164 = vmatpush3.bf16.msra.mxu0 %v2296_v35 }
 0x152   : > { %2165 = vmatprep.subr.bf16.mxu0 %v2377_v15 }
 0x155   : > { %2166 = vmatpush3.bf16.msra.mxu0 %v2297_v36 }
 0x156   : > { %2167 = vmatprep.subr.bf16.mxu0 %v2377_v15 }
 0x159   : > { %2168 = vmatpush3.bf16.msra.mxu0 %v2298_v37 }
 0x20c   : > { %v686_v46 = vpop.f32.mrf.mxu0 }
 0x20d   : > { %v2579_v51 = vadd.f32 %v2048_v45, %v686_v46  ;;  %v979_v46 = vld [vmem:[%s2927_s12 + $0x28] sm:$0xff] }
 0x20e   : > { %v2147_v52 = vpop.f32.mrf.mxu0 }
 0x20f   : > { %v705_v60 = vrot.slane %v2579_v51, 5  ;;  %v726_v63 = vrot.slane %v2579_v51, 6  ;;  %v747_v1 = vrot.slane %v2579_v51, 7  ;;  %v701_v12 = vmul.f32 %v700_v54, %v2579_v51  ;;  %v975_v52 = vld [vmem:[%s2927_s12 + $0x8] sm:$0xff] }
 0x210   : > { %v689_v53 = vpop.f32.mrf.mxu0 }
 0x211   : > { %v2583_v56 = vadd.f32 %v2048_v45, %v689_v53  ;;  %v980_v45 = vld [vmem:[%s2927_s12 + $0x30] sm:$0xff]  ;;  %v974_v53 = vld [vmem:[%s2927_s12] sm:$0xff] }
 0x212   : > { %v2148_v59 = vpop.f32.mrf.mxu0 }
 0x213   : > { %v790_v61 = vpack.c.bf16 %v2583_v56, %v2579_v51  ;;  %v706_v62 = vrot.slane %v2583_v56, 5  ;;  %v727_v0 = vrot.slane %v2583_v56, 6  ;;  %v748_v2 = vrot.slane %v2583_v56, 7  ;;  %v969_v59 = vld [vmem:[%s2926_s11 + $0x58] sm:$0xff] }
 0x214   : > { %v702_v8 = vmul.f32 %v700_v54, %v2583_v56  ;;  %v973_v54 = vld [vmem:[%s2926_s11 + $0x78] sm:$0xff] }
 0x215   : > { %2170 = vmatmul.mubr.msk.bf16.vlgmr.msra.gmra.mxu0 %vm830_vm2, %v790_v61  ;;  %v708_v4 = vsel %vm707_vm3, %v705_v60, %v706_v62  ;;  %v709_v5 = vsel %vm707_vm3, %v706_v62, %v705_v60  ;;  %v729_v6 = vsel %vm728_vm4, %v726_v63, %v727_v0  ;;  %v730_v7 = vsel %vm728_vm4, %v727_v0, %v726_v63  ;;  %v968_v60 = vld [vmem:[%s2926_s11 + $0x50] sm:$0xff]  ;;  %v967_v61 = vld [vmem:[%s2926_s11 + $0x48] sm:$0xff]  ;;  %v966_v62 = vld [vmem:[%s2926_s11 + $0x40] sm:$0xff] }
 0x216   : > { %v714_v9 = vsel %vm703_vm5, %v709_v5, 0.0  ;;  %v721_v10 = vmul.f32 %v719_v57, %v708_v4  ;;  %v735_v11 = vsel %vm724_vm6, %v730_v7, 0.0  ;;  %v750_v14 = vsel %vm749_vm8, %v747_v1, %v748_v2  ;;  %2192 = vmatprep.subr.mxu0 %v973_v54  ;;  %v965_v63 = vld [vmem:[%s2926_s11 + $0x38] sm:$0xff]  ;;  %v964_v0 = vld [vmem:[%s2926_s11 + $0x30] sm:$0xff]  ;;  %v959_v5 = vld [vmem:[%s2926_s11 + $0x8] sm:$0xff] }
 0x217   : > { %v720_v13 = vmul.f32 %v719_v57, %v714_v9  ;;  %v751_v16 = vsel %vm749_vm8, %v748_v2, %v747_v1  ;;  %v742_v18 = vmul.f32 %v740_v58, %v729_v6  ;;  %v741_v21 = vmul.f32 %v740_v58, %v735_v11  ;;  %2193 = vmatpush3.msra.mxu0 %v973_v54  ;;  %v971_v57 = vld [vmem:[%s2926_s11 + $0x68] sm:$0xff]  ;;  %v970_v58 = vld [vmem:[%s2926_s11 + $0x60] sm:$0xff]  ;;  %v960_v4 = vld [vmem:[%s2926_s11 + $0x10] sm:$0xff] }
 0x218   : > { %v723_v17 = vadd.f32 %v721_v10, %v702_v8  ;;  %v756_v19 = vsel %vm745_vm7, %v751_v16, 0.0  ;;  %v763_v23 = vmul.f32 %v761_v3, %v750_v14  ;;  %2194 = vmatprep.subr.mxu0 %v972_v55  ;;  %v963_v1 = vld [vmem:[%s2926_s11 + $0x28] sm:$0xff]  ;;  %v962_v2 = vld [vmem:[%s2926_s11 + $0x20] sm:$0xff] }
 0x219   : > { %v722_v20 = vadd.f32 %v720_v13, %v701_v12  ;;  %v762_v25 = vmul.f32 %v761_v3, %v756_v19  ;;  %2195 = vmatpush3.msra.mxu0 %v972_v55  ;;  %v961_v3 = vld [vmem:[%s2926_s11 + $0x18] sm:$0xff]  ;;  %v958_v6 = vld [vmem:[%s2926_s11] sm:$0xff] }
 0x21a   : > { %v744_v22 = vadd.f32 %v742_v18, %v723_v17  ;;  %2196 = vmatprep.subr.mxu0 %v971_v57  ;;  %v2061_v7 = vld [vmem:[%s2925_s10] ss:$0 sm:$0xff] }
 0x21b   : > { %v743_v24 = vadd.f32 %v741_v21, %v722_v20  ;;  %2197 = vmatpush3.msra.mxu0 %v971_v57  ;;  %v2055_v16 = vld [vmem:[%s2923_s8] ss:$0 sm:$0xff] }
 0x21c   : > { %v765_v27 = vadd.f32 %v763_v23, %v744_v22  ;;  %2198 = vmatprep.subr.mxu0 %v970_v58 }
 0x21d   : > { %v764_v28 = vadd.f32 %v762_v25, %v743_v24  ;;  %2199 = vmatpush3.msra.mxu0 %v970_v58 }
 0x21e   : > { %v774_v29 = vadd.f32 %v2052_v26, %v765_v27  ;;  %2200 = vmatprep.subr.mxu0 %v969_v59 }
 0x21f   : > { %v773_v30 = vadd.f32 %v2052_v26, %v764_v28  ;;  %2201 = vmatpush3.msra.mxu0 %v969_v59  ;;  %v2069_v28 = vld [vmem:[%s2928_s13] ss:$0 sm:$0xff] }
 0x220   : > { %v2054_v31 = vmul.f32 -1.442695, %v774_v29  ;;  %2202 = vmatprep.subr.mxu0 %v968_v60 }
 0x221   : > { %v2053_v32 = vmul.f32 -1.442695, %v773_v30  ;;  %2203 = vmatpush3.msra.mxu0 %v968_v60 }
 0x222   : > { %2311 = vpow2.f32 %v2054_v31  ;;  %2204 = vmatprep.subr.mxu0 %v967_v61 }
 0x223   : > { %2313 = vpow2.f32 %v2053_v32  ;;  %2205 = vmatpush3.msra.mxu0 %v967_v61 }
 0x224   : > { %2206 = vmatprep.subr.mxu0 %v966_v62 }
 0x225   : > { %2207 = vmatpush3.msra.mxu0 %v966_v62 }
 0x226   : > { %2208 = vmatprep.subr.mxu0 %v965_v63 }
 0x227   : > { %2209 = vmatpush3.msra.mxu0 %v965_v63 }
 0x228   : > { %2210 = vmatprep.subr.mxu0 %v964_v0 }
 0x229   : > { %2211 = vmatpush3.msra.mxu0 %v964_v0 }
 0x22a   : > { %2212 = vmatprep.subr.mxu0 %v963_v1 }
 0x22b   : > { %2213 = vmatpush3.msra.mxu0 %v963_v1 }
 0x22c   : > { %2214 = vmatprep.subr.mxu0 %v962_v2 }
 0x22d   : > { %2215 = vmatpush3.msra.mxu0 %v962_v2 }
 0x22e   : > { %2216 = vmatprep.subr.mxu0 %v961_v3 }
 0x22f   : > { %v2312_v33 = vpop.eup %2311  ;;  %2217 = vmatpush3.msra.mxu0 %v961_v3 }
 0x230   : > { %v2314_v34 = vpop.eup %2313  ;;  %v782_v35 = vadd.f32 1.0, %v2312_v33  ;;  %2218 = vmatprep.subr.mxu0 %v960_v4 }
 0x231   : > { %v781_v36 = vadd.f32 1.0, %v2314_v34  ;;  %2219 = vmatpush3.msra.mxu0 %v960_v4 }
 0x232   : > { %2315 = vrcp.f32 %v782_v35  ;;  %2220 = vmatprep.subr.mxu0 %v959_v5 }
 0x233   : > { %2317 = vrcp.f32 %v781_v36  ;;  %2221 = vmatpush3.msra.mxu0 %v959_v5 }
 0x234   : > { %2222 = vmatprep.subr.mxu0 %v958_v6 }
 0x235   : > { %2223 = vmatpush3.msra.mxu0 %v958_v6 }
 0x236   : > { %2239 = vmatprep.subr.bf16.mxu0 %v2377_v15 }
 0x23f   : > { %v2316_v37 = vpop.eup %2315 }
 0x240   : > { %v2318_v38 = vpop.eup %2317  ;;  %v2625_v39 = vmul.f32 %v2316_v37, %v774_v29 }
 0x241   : > { %v2627_v40 = vmul.f32 %v2318_v38, %v773_v30 }
 0x243   : > { %v789_v41 = vpack.c.bf16 %v2625_v39, %v2627_v40 }
 0x245   : > { %2158 = vmatmul.mubr.msk.bf16.vlgmr.msra.gmra.mxu1 %vm830_vm2, %v789_v41 }
 0x246   : > { %2174 = vmatpush3.msra.mxu1 %v2562_v42  ;;  %v976_v42 = vld [vmem:[%s2927_s12 + $0x10] sm:$0xff] }
 0x247   : > { %2175 = vmatprep.subr.mxu1 %v980_v45 }
 0x248   : > { %2176 = vmatpush3.msra.mxu1 %v980_v45 }
 0x249   : > { %2177 = vmatprep.subr.mxu1 %v979_v46 }
 0x24a   : > { %2178 = vmatpush3.msra.mxu1 %v979_v46 }
 0x24b   : > { %2179 = vmatprep.subr.mxu1 %v978_v47 }
 0x24c   : > { %2180 = vmatpush3.msra.mxu1 %v978_v47 }
 0x24d   : > { %2181 = vmatprep.subr.mxu1 %v977_v48 }
 0x24e   : > { %2182 = vmatpush3.msra.mxu1 %v977_v48 }
 0x24f   : > { %2183 = vmatprep.subr.mxu1 %v976_v42 }
 0x250   : > { %2184 = vmatpush3.msra.mxu1 %v976_v42 }
 0x251   : > { %2185 = vmatprep.subr.mxu1 %v975_v52 }
 0x252   : > { %2186 = vmatpush3.msra.mxu1 %v975_v52 }
 0x253   : > { %2187 = vmatprep.subr.mxu1 %v974_v53 }
 0x254   : > { %2188 = vmatpush3.msra.mxu1 %v974_v53 }
 0x255   : > { %2227 = vmatprep.subr.bf16.mxu1 %v2377_v15 }
 0x2d5   : > { %v951_v8 = vpop.f32.mrf.mxu0 }
 0x2d6   : > { %v2707_v9 = vadd.f32 %v2061_v7, %v951_v8 }
 0x2d7   : > { %v2171_v10 = vpop.f32.mrf.mxu0 }
 0x2d8   : > { %2189 = vmatprep.mubr.msk.f32.mxu1 %vm830_vm2, %v2707_v9 }
 0x2d9   : > { %v954_v11 = vpop.f32.mrf.mxu0 }
 0x2da   : > { %v2711_v12 = vadd.f32 %v2061_v7, %v954_v11 }
 0x2db   : > { %v2172_v13 = vpop.f32.mrf.mxu0 }
 0x2dc   : > { %2190 = vmatmul.mubr.msk.f32.vlgmr.msra.gmra.mxu1 %vm830_vm2, %v2711_v12  ;;  %v2288_v14 = vpack.i.bf16 %v2711_v12, %v2707_v9  ;;  %v1539_v22 = vpack.c.bf16 %v2711_v12, %v2707_v9 }
 0x2dd   : > { %2229 = vmatprep.mubr.msk.bf16.mxu1 %vm2378_vm1, %v2377_v15 }
 0x305   : > { %v868_v17 = vpop.f32.mrf.mxu1 }
 0x306   : > { %v2722_v18 = vadd.f32 %v2055_v16, %v868_v17 }
 0x307   : > { %v2159_v19 = vpop.f32.mrf.mxu1 }
 0x308   : > { %2224 = vmatprep.mubr.f32.mxu0 %v2722_v18 }
 0x309   : > { %v871_v20 = vpop.f32.mrf.mxu1 }
 0x30a   : > { %v2725_v21 = vadd.f32 %v2055_v16, %v871_v20 }
 0x30b   : > { %v2160_v23 = vpop.f32.mrf.mxu1 }
 0x30c   : > { %2225 = vmatmul.mubr.f32.vlgmr.msra.gmra.mxu0 %v2725_v21  ;;  %v2281_v24 = vpack.i.bf16 %v2725_v21, %v2722_v18  ;;  %v2734_v25 = vpack.c.bf16 %v2725_v21, %v2722_v18 }
 0x30d   : > { %2240 = vmatpush3.bf16.msra.mxu0 %v1539_v22  ;;  %2241 = vmatprep.mubr.msk.bf16.mxu0 %vm2378_vm1, %v2377_v15 }
 0x30e   : > { %2245 = vmatprep.subr.bf16.mxu0 %v2377_v15 }
 0x39c   : > { %v2191_v26 = vpop.f32.mrf.mxu1 }
 0x39e   : > { %v1054_v30 = vpop.f32.mrf.mxu1 }
 0x3cc   : > { %v2226_v27 = vpop.f32.mrf.mxu0 }
 0x3cd   : > { %v1135_v29 = vadd.f32 %v2226_v27, %v2191_v26 }
 0x3ce   : > { %v1129_v31 = vpop.f32.mrf.mxu0 }
 0x3cf   : > { %v2742_v32 = vadd.f32 %v2069_v28, %v1135_v29  ;;  %v1130_v33 = vadd.f32 %v1129_v31, %v1054_v30 }
 0x3d1   : > { %v1148_v34 = vsub.f32 0.0, %v2742_v32  ;;  %v2745_v35 = vadd.f32 %v2069_v28, %v1130_v33 }
 0x3d3   : > { %v1156_v36 = vand.u32 2147483647, %v1148_v34  ;;  %v1147_v37 = vsub.f32 0.0, %v2745_v35  ;;  %v1150_v1 = vmax.f32 %v1148_v34, 0.0  ;;  %vm1152_vm11 = vcmp.ne.f32.partialorder %v1148_v34, %v1148_v34 }
 0x3d5   : > { %v1158_v38 = vsub.f32 0.0, %v1156_v36  ;;  %v1155_v41 = vand.u32 2147483647, %v1147_v37  ;;  %v1149_v6 = vmax.f32 %v1147_v37, 0.0  ;;  %vm1151_vm12 = vcmp.ne.f32.partialorder %v1147_v37, %v1147_v37 }
 0x3d7   : > { %v1161_v45 = vmul.f32 1.442695, %v1158_v38  ;;  %v1157_v46 = vsub.f32 0.0, %v1155_v41 }
 0x3d9   : > { %2319 = vpow2.f32 %v1161_v45  ;;  %v1159_v47 = vmul.f32 1.442695, %v1157_v46 }
 0x3db   : > { %2321 = vpow2.f32 %v1159_v47 }
 0x3e6   : > { %v2320_v48 = vpop.eup %2319 }
 0x3e7   : > { %v1172_v42 = vadd.f32 1.0, %v2320_v48  ;;  %v1175_v54 = vmul.f32 -0.5, %v2320_v48  ;;  %v1178_v58 = vand.u32 2147483647, %v2320_v48 }
 0x3e8   : > { %v2322_v52 = vpop.eup %2321 }
 0x3e9   : > { %2323 = vlog2.f32 %v1172_v42  ;;  %v1163_v53 = vadd.f32 1.0, %v2322_v52  ;;  %v1166_v55 = vmul.f32 -0.5, %v2322_v52  ;;  %v1176_v57 = vadd.f32 1.0, %v1175_v54 }
 0x3ea   : > { %v1169_v61 = vand.u32 2147483647, %v2322_v52  ;;  %vm1179_vm9 = vcmp.lt.f32.partialorder %v1178_v58, 0.0004427343 }
 0x3eb   : > { %2325 = vlog2.f32 %v1163_v53  ;;  %v1167_v59 = vadd.f32 1.0, %v1166_v55  ;;  %v1177_v63 = vmul.f32 %v2320_v48, %v1176_v57 }
 0x3ec   : > { %vm1170_vm10 = vcmp.lt.f32.partialorder %v1169_v61, 0.0004427343 }
 0x3ed   : > { %v1168_v4 = vmul.f32 %v2322_v52, %v1167_v59 }
 0x3f6   : > { %v2324_v60 = vpop.eup %2323 }
 0x3f7   : > { %v1174_v62 = vmul.f32 0.6931472, %v2324_v60  ;;  %v2382_v60 = vmov 2  }
 0x3f8   : > { %v2326_v0 = vpop.eup %2325  ;;  %2286 = vset.pattern.permute.xlu0 %v2382_v60  ;;  %2287 = vset.pattern.permute.xlu1 %v2382_v60 }
 0x3f9   : > { %v1180_v2 = vsel %vm1179_vm9, %v1177_v63, %v1174_v62  ;;  %v1165_v3 = vmul.f32 0.6931472, %v2326_v0 }
 0x3fa   : > { %v1182_v5 = vadd.f32 %v1180_v2, %v1150_v1 }
 0x3fb   : > { %v1171_v7 = vsel %vm1170_vm10, %v1168_v4, %v1165_v3 }
 0x3fc   : > { %v1184_v8 = vsel %vm1152_vm11, %v1148_v34, %v1182_v5  ;;  %v1181_v10 = vadd.f32 %v1171_v7, %v1149_v6 }
 0x3fd   : > { %v1186_v11 = vsub.f32 0.0, %v1184_v8 }
 0x3fe   : > { %v1183_v13 = vsel %vm1151_vm12, %v1147_v37, %v1181_v10 }
 0x3ff   : > { %1191 = vrot.lane.b32.xlu1 %v1186_v11, %s2379_s0  ;;  %v1185_v16 = vsub.f32 0.0, %v1183_v13 }
 0x401   : > { %1189 = vrot.lane.b32.xlu0 %v1185_v16, %s2379_s0 }
 0x471   : > { %v1192_v17 = vpop.permute.xlu1 %1191 }
 0x472   : > { %v1196_v20 = vrot.slane %v1192_v17, 7 }
 0x473   : > { %v1190_v19 = vpop.permute.xlu0 %1189 }
 0x474   : > { %v1195_v22 = vrot.slane %v1190_v19, 7 }
 0x476   : > { %v1198_v23 = vsel %vm749_vm8, %v1196_v20, %v1195_v22  ;;  %v1197_v27 = vsel %vm749_vm8, %v1195_v22, %v1196_v20 }
 0x477   : > { %v1199_v26 = vsel %vm745_vm7, %v1198_v23, 0.0 }
 0x478   : > { %1203 = vrot.lane.b32.xlu1 %v1199_v26, %s2380_s19 }
 0x47c   : > { %1205 = vrot.lane.b32.xlu1 %v1197_v27, %s2380_s19 }
 0x4ea   : > { %v1204_v28 = vpop.permute.xlu1 %1203 }
 0x4eb   : > { %v1209_v29 = vadd.f32 %v1204_v28, %v1185_v16 }
 0x4ed   : > { %1213 = vrot.lane.b32.xlu0 %v1209_v29, %s2379_s0 }
 0x4ee   : > { %v1206_v30 = vpop.permute.xlu1 %1205 }
 0x4ef   : > { %v1210_v31 = vadd.f32 %v1206_v30, %v1186_v11 }
 0x4f1   : > { %1215 = vrot.lane.b32.xlu1 %v1210_v31, %s2379_s0 }
 0x55f   : > { %v1214_v33 = vpop.permute.xlu0 %1213 }
 0x560   : > { %v1219_v36 = vrot.slane %v1214_v33, 6 }
 0x563   : > { %v1216_v34 = vpop.permute.xlu1 %1215 }
 0x564   : > { %v1220_v37 = vrot.slane %v1216_v34, 6 }
 0x566   : > { %v1221_v38 = vsel %vm728_vm4, %v1219_v36, %v1220_v37  ;;  %v1222_v41 = vsel %vm728_vm4, %v1220_v37, %v1219_v36  ;;  %vm1498_vm4 = vcmask 130048  }
 0x567   : > { %1229 = vrot.lane.b32.xlu1 %v1221_v38, %s2380_s19  ;;  %v1223_v45 = vsel %vm724_vm6, %v1222_v41, 0.0 }
 0x568   : > { %1227 = vrot.lane.b32.xlu0 %v1223_v45, %s2380_s19  ;;  %v1293_v45 = vand.u32 127, %v693_v43 }
 0x56a   : > { %vm1294_vm3 = vcmp.ge.s32.totalorder %v2566_v44, %v1293_v45 }
 0x5d9   : > { %v1230_v46 = vpop.permute.xlu1 %1229 }
 0x5da   : > { %v1234_v47 = vadd.f32 %v1230_v46, %v1210_v31  ;;  %v1228_v48 = vpop.permute.xlu0 %1227 }
 0x5db   : > { %v1233_v42 = vadd.f32 %v1228_v48, %v1209_v29 }
 0x5dc   : > { %1241 = vrot.lane.b32.xlu1 %v1234_v47, %s2379_s0 }
 0x5dd   : > { %1239 = vrot.lane.b32.xlu0 %v1233_v42, %s2379_s0 }
 0x64e   : > { %v1242_v52 = vpop.permute.xlu1 %1241 }
 0x64f   : > { %v1246_v53 = vrot.slane %v1242_v52, 4  ;;  %v1240_v54 = vpop.permute.xlu0 %1239 }
 0x650   : > { %v1245_v55 = vrot.slane %v1240_v54, 4 }
 0x652   : > { %v1249_v57 = vsel %vm1247_vm13, %v1246_v53, %v1245_v55  ;;  %v1248_v58 = vsel %vm1247_vm13, %v1245_v55, %v1246_v53 }
 0x653   : > { %v1254_v59 = vsel %vm1235_vm14, %v1249_v57, 0.0 }
 0x654   : > { %1258 = vrot.lane.b32.xlu0 %v1254_v59, %s2380_s19 }
 0x658   : > { %2282 = vrot.lane.b32.xlu0 %v2281_v24, %s2381_s20 }
 0x65c   : > { %1284 = vrot.lane.b32.xlu0 %v2377_v15, %s2380_s19 }
 0x660   : > { %1542 = vrot.lane.b32.xlu0 %v2734_v25, %s2383_s21 }
 0x6c6   : > { %v1259_v61 = vpop.permute.xlu0 %1258 }
 0x6c7   : > { %v1264_v62 = vadd.f32 %v1259_v61, %v1233_v42 }
 0x6c9   : > { %1270 = vrot.lane.b32.xlu1 %v1264_v62, %s2379_s0 }
 0x6ca   : > { %v2283_v63 = vpop.permute.xlu0 %2282 }
 0x6cb   : > { %v2285_v1 = vunpack.i.h.bf16 %v2283_v63  ;;  %v2284_v2 = vunpack.i.l.bf16 %v2283_v63 }
 0x6cd   : > { %1260 = vrot.lane.b32.xlu1 %v1248_v58, %s2380_s19  ;;  %v1532_v4 = vpack.c.bf16 %v2285_v1, %v2284_v2 }
 0x6ce   : > { %v1285_v0 = vpop.permute.xlu0 %1284 }
 0x6cf   : > { %v1290_v18 = vadd.f32 %v1285_v0, %v1264_v62 }
 0x6d1   : > { %1298 = vrot.lane.b32.xlu0 %v1290_v18, %s2384_s22 }
 0x6d2   : > { %v1543_v21 = vpop.permute.xlu0 %1542 }
 0x6d3   : > { %v1548_v24 = vsel %vm579_vm0, %v1543_v21, 0 }
 0x6d4   : > { %2228 = vmatpush3.bf16.xpose.msra.mxu1 %v1548_v24 }
 0x6d5   : > { %1302 = vrot.lane.b32.xlu0 %v1290_v18, %s2379_s0  ;;  %2233 = vmatprep.subr.bf16.mxu1 %v2377_v15 }
 0x6d9   : > { %1340 = vrot.lane.b32.xlu0 %v1290_v18, %s2385_s2 }
 0x6db   : > { %2230 = vmatmul.mubr.msk.bf16.vlgmr.msra.gmra.mxu1 %vm579_vm0, %v2734_v25 }
 0x6dc   : > { %2235 = vmatprep.mubr.msk.bf16.mxu1 %vm2378_vm1, %v2377_v15 }
 0x6dd   : > { %1412 = vrot.lane.b32.xlu0 %v2745_v35, %s2384_s22 }
 0x6e1   : > { %1451 = vperm.xlu0 %2286, %v1290_v18  }
 0x73b   : > { %v1271_v3 = vpop.permute.xlu1 %1270 }
 0x73c   : > { %1286 = vrot.lane.b32.xlu1 %v1271_v3, %s2380_s19  ;;  %s575_s19 = scalar_lea.vmem %s2933_s18, %s2085_s29 }
 0x73f   : > { %v1261_v8 = vpop.permute.xlu1 %1260 }
 0x740   : > { %1592 = vrot.lane.b32.xlu1 %v1532_v4, %s2383_s21  ;;  %v1265_v10 = vadd.f32 %v1261_v8, %v1234_v47 }
 0x743   : > { %v1299_v19 = vpop.permute.xlu0 %1298 }
 0x747   : > { %v1303_v20 = vpop.permute.xlu0 %1302 }
 0x74b   : > { %v1341_v26 = vpop.permute.xlu0 %1340 }
 0x74f   : > { %v1413_v27 = vpop.permute.xlu0 %1412 }
 0x79b   : > { %v2795_v5 = vpop.f32.mrf.mxu1 }
 0x79d   : > { %v2231_v6 = vpop.f32.mrf.mxu1 }
 0x79f   : > { %v2797_v7 = vpop.f32.mrf.mxu1 }
 0x7a1   : > { %v2232_v25 = vpop.f32.mrf.mxu1 }
 0x7ae   : > { %v1287_v11 = vpop.permute.xlu1 %1286 }
 0x7af   : > { %v1291_v13 = vadd.f32 %v1287_v11, %v1265_v10 }
 0x7b1   : > { %1300 = vrot.lane.b32.xlu1 %v1291_v13, %s2384_s22 }
 0x7b2   : > { %v1593_v16 = vpop.permute.xlu1 %1592 }
 0x7b3   : > { %v1598_v17 = vsel %vm579_vm0, %v1593_v16, 0 }
 0x7b4   : > { %2234 = vmatpush3.bf16.xpose.msra.mxu1 %v1598_v17 }
 0x7b5   : > { %1304 = vrot.lane.b32.xlu1 %v1291_v13, %s2379_s0  ;;  %2251 = vmatprep.subr.bf16.mxu1 %v2377_v15 }
 0x7b9   : > { %1414 = vrot.lane.b32.xlu1 %v2742_v32, %s2384_s22  ;;  %s2386_s22 = smov 32  }
 0x7bb   : > { %2236 = vmatmul.mubr.msk.bf16.vlgmr.msra.gmra.mxu1 %vm579_vm0, %v1532_v4 }
 0x7bc   : > { %2259 = vmatprep.mubr.msk.bf16.mxu1 %vm2378_vm1, %v2377_v15 }
 0x7bd   : > { %1342 = vrot.lane.b32.xlu1 %v1291_v13, %s2385_s2 }
 0x7c1   : > { %1459 = vperm.xlu1 %2287, %v1299_v19  }
 0x7c5   : > { %1455 = vperm.xlu1 %2287, %v1291_v13  }
 0x7ee   : > { %1308 = vxpose.xlu1.b32.start [1/2] (short) (narrow) %v1303_v20, 8 }
 0x823   : > { %v1301_v22 = vpop.permute.xlu1 %1300 }
 0x824   : > { %1463 = vperm.xlu0 %2286, %v1301_v22  }
 0x827   : > { %v1305_v23 = vpop.permute.xlu1 %1304 }
 0x828   : > { %1309 = vxpose.xlu1.b32.end [2/2] (short) (narrow) %v1305_v23, 8 }
 0x82b   : > { %v1415_v28 = vpop.permute.xlu1 %1414 }
 0x82f   : > { %v1343_v29 = vpop.permute.xlu1 %1342 }
 0x83c   : > { %v1460_v36 = vpop.permute.xlu1 %1459 }
 0x840   : > { %v1456_v37 = vpop.permute.xlu1 %1455 }
 0x842   : > { %1378 = vxpose.xlu0.b32.start [1/2] (short) (narrow) %v2745_v35, 8  ;;  %v1452_v35 = vpop.permute.xlu0 %1451 }
 0x846   : > { %1379 = vxpose.xlu0.b32.end [2/2] (short) (narrow) %v2742_v32, 8  ;;  %v695_v32 = vadd.s32 8, %v2566_v44 }
 0x848   : > { %vm1295_vm15 = vcmp.ge.s32.totalorder %v695_v32, %v1293_v45 }
 0x84a   : > { %1418 = vxpose.xlu0.b32.start [1/2] (short) (narrow) %v1413_v27, 8 }
 0x84e   : > { %1419 = vxpose.xlu0.b32.end [2/2] (short) (narrow) %v1415_v28, 8 }
 0x852   : > { %1346 = vxpose.xlu0.b32.start [1/2] (short) (narrow) %v1341_v26, 8 }
 0x856   : > { %1347 = vxpose.xlu0.b32.end [2/2] (short) (narrow) %v1343_v29, 8 }
 0x87b   : > { %v2810_v30 = vpop.f32.mrf.mxu1 }
 0x87d   : > { %v2237_v31 = vpop.f32.mrf.mxu1 }
 0x87f   : > { %v2812_v33 = vpop.f32.mrf.mxu1 }
 0x881   : > { %v2238_v34 = vpop.f32.mrf.mxu1 }
 0x89f   : > { %v1464_v46 = vpop.permute.xlu0 %1463 }
 0x8a0   : > { %v1324_v38 = vpop.trf.xlu1 }
 0x8a1   : > { %v1469_v41 = vrot.slane %v1324_v38, %v2576_v49 }
 0x8a3   : > { %v1474_v47 = vsub.f32 %v1452_v35, %v1469_v41  ;;  %v1475_v48 = vsub.f32 %v1456_v37, %v1469_v41 }
 0x8a5   : > { %v1483_v53 = vsel %vm1295_vm15, %v1475_v48, -inf  ;;  %v1482_v54 = vsel %vm1294_vm3, %v1474_v47, -inf }
 0x8be   : > { %v1394_v42 = vpop.trf.xlu0 }
 0x8bf   : > { %v1489_v52 = vrot.slane %v1394_v42, %v2576_v49 }
 0x8c1   : > { %v1495_v55 = vadd.f32 %v1489_v52, %v1483_v53  ;;  %v1494_v57 = vadd.f32 %v1489_v52, %v1482_v54 }
 0x8c3   : > { %v1502_v58 = vsel %vm1498_vm4, %v1495_v55, -inf  ;;  %v1499_v43 = vsel %vm1498_vm4, %v1494_v57, -inf }
 0x8c4   : > { %1503 = vmax.xlane.f32.xlu0 %v1502_v58  ;;  %1500 = vmax.xlane.f32.xlu1 %v1499_v43 }
 0x8c6   : > { %v1434_v59 = vpop.trf.xlu0 }
 0x8c7   : > { %v1493_v0 = vrot.slane %v1434_v59, %v2576_v49 }
 0x8ce   : > { %v1362_v60 = vpop.trf.xlu0 }
 0x8cf   : > { %v1473_v61 = vrot.slane %v1362_v60, %v2576_v49 }
 0x8d1   : > { %v1476_v62 = vsub.f32 %v1460_v36, %v1473_v61  ;;  %v1477_v63 = vsub.f32 %v1464_v46, %v1473_v61 }
 0x8d3   : > { %v1484_v18 = vsel %vm1294_vm3, %v1476_v62, -inf  ;;  %v1485_v21 = vsel %vm1295_vm15, %v1477_v63, -inf }
 0x8d4   : > { %v1496_v24 = vadd.f32 %v1493_v0, %v1484_v18  ;;  %v1497_v2 = vadd.f32 %v1493_v0, %v1485_v21 }
 0x8d6   : > { %v1505_v1 = vsel %vm1498_vm4, %v1496_v24, -inf  ;;  %v1508_v3 = vsel %vm1498_vm4, %v1497_v2, -inf }
 0x8d7   : > { %1506 = vmax.xlane.f32.xlu1 %v1505_v1 }
 0x8db   : > { %1509 = vmax.xlane.f32.xlu1 %v1508_v3 }
 0x94d   : > { %v1504_v4 = vpop.xlane.xlu0 %1503  ;;  %v1501_v6 = vpop.xlane.xlu1 %1500 }
 0x94e   : > { %v1512_v25 = vsub.f32 %v1495_v55, %v1504_v4  ;;  %v1511_v8 = vsub.f32 %v1494_v57, %v1501_v6  ;;  %v1662_v35 = vsub.f32 0.0, %v1504_v4  ;;  %v1661_v41 = vsub.f32 0.0, %v1501_v6 }
 0x950   : > { %v1517_v10 = vmul.f32 1.442695, %v1512_v25  ;;  %v1515_v11 = vmul.f32 1.442695, %v1511_v8  ;;  %v1667_v32 = vmul.f32 1.442695, %v1662_v35 }
 0x951   : > { %v1665_v45 = vmul.f32 1.442695, %v1661_v41 }
 0x952   : > { %2327 = vpow2.f32 %v1517_v10 }
 0x953   : > { %2329 = vpow2.f32 %v1515_v11 }
 0x95f   : > { %v2328_v13 = vpop.eup %2327 }
 0x960   : > { %v1507_v16 = vpop.xlane.xlu1 %1506  ;;  %v1642_v17 = vmul.f32 %v2328_v13, %v2797_v7  ;;  %v2330_v19 = vpop.eup %2329 }
 0x961   : > { %v1513_v20 = vsub.f32 %v1496_v24, %v1507_v16  ;;  %v1641_v23 = vmul.f32 %v2330_v19, %v2795_v5 }
 0x962   : > { %v1648_v22 = vsel %vm1498_vm4, %v1642_v17, 0.0 }
 0x963   : > { %v1519_v26 = vmul.f32 1.442695, %v1513_v20  ;;  %1649 = vadd.xlane.f32.xlu0 %v1648_v22  ;;  %v1645_v27 = vsel %vm1498_vm4, %v1641_v23, 0.0 }
 0x964   : > { %v1510_v28 = vpop.xlane.xlu1 %1509  ;;  %1646 = vadd.xlane.f32.xlu1 %v1645_v27 }
 0x965   : > { %2331 = vpow2.f32 %v1519_v26  ;;  %v1514_v29 = vsub.f32 %v1497_v2, %v1510_v28  ;;  %v1664_v55 = vsub.f32 0.0, %v1510_v28 }
 0x967   : > { %v1521_v31 = vmul.f32 1.442695, %v1514_v29  ;;  %v1671_v12 = vmul.f32 1.442695, %v1664_v55 }
 0x969   : > { %2333 = vpow2.f32 %v1521_v31 }
 0x96a   : > { %2335 = vpow2.f32 %v1667_v32 }
 0x96b   : > { %2337 = vpow2.f32 %v1665_v45 }
 0x972   : > { %v2332_v34 = vpop.eup %2331 }
 0x973   : > { %v1643_v36 = vmul.f32 %v2332_v34, %v2810_v30  ;;  %v1663_v30 = vsub.f32 0.0, %v1507_v16 }
 0x975   : > { %v1651_v7 = vsel %vm1498_vm4, %v1643_v36, 0.0  ;;  %v1669_v54 = vmul.f32 1.442695, %v1663_v30 }
 0x976   : > { %v2334_v37 = vpop.eup %2333  ;;  %1652 = vadd.xlane.f32.xlu1 %v1651_v7 }
 0x977   : > { %v1644_v38 = vmul.f32 %v2334_v37, %v2812_v33  ;;  %v2336_v48 = vpop.eup %2335 }
 0x978   : > { %v2338_v53 = vpop.eup %2337 }
 0x979   : > { %v1654_v5 = vsel %vm1498_vm4, %v1644_v38, 0.0 }
 0x97a   : > { %1655 = vadd.xlane.f32.xlu0 %v1654_v5 }
 0x987   : > { %2289 = vrot.lane.b32.xlu1 %v2288_v14, %s2381_s20 }
 0x9ec   : > { %v1650_v46 = vpop.xlane.xlu0 %1649 }
 0x9ed   : > { %v1658_v47 = vand.u32 2147483647, %v1650_v46  ;;  %v1647_v42 = vpop.xlane.xlu1 %1646 }
 0x9ee   : > { %v1657_v52 = vand.u32 2147483647, %v1647_v42 }
 0x9ef   : > { %v1674_v33 = vmax.f32 %v1658_v47, %v2336_v48 }
 0x9f0   : > { %v1673_v58 = vmax.f32 %v1657_v52, %v2338_v53 }
 0x9f1   : > { %v1678_v57 = vadd.f32 1e-06, %v1674_v33 }
 0x9f2   : > { %v1677_v9 = vadd.f32 1e-06, %v1673_v58 }
 0x9f3   : > { %2339 = vrcp.f32 %v1678_v57 }
 0x9f4   : > { %2341 = vpow2.f32 %v1669_v54 }
 0x9f5   : > { %2343 = vrcp.f32 %v1677_v9 }
 0x9f6   : > { %2345 = vpow2.f32 %v1671_v12 }
 0x9ff   : > { %v1653_v14 = vpop.xlane.xlu1 %1652 }
 0xa00   : > { %v2340_v43 = vpop.eup %2339  ;;  %v1659_v59 = vand.u32 2147483647, %v1653_v14  ;;  %v2075_v14 = vmul.f32 -1.442695, %v2579_v51 }
 0xa01   : > { %v2342_v60 = vpop.eup %2341  ;;  %v1686_v61 = vmul.f32 %v2340_v43, %v1642_v17  ;;  %v2076_v43 = vmul.f32 -1.442695, %v2583_v56 }
 0xa02   : > { %v2344_v62 = vpop.eup %2343  ;;  %v1675_v63 = vmax.f32 %v1659_v59, %v2342_v60 }
 0xa03   : > { %v1656_v0 = vpop.xlane.xlu0 %1655  ;;  %v2290_v18 = vpop.permute.xlu1 %2289  ;;  %v1685_v21 = vmul.f32 %v2344_v62, %v1641_v23 }
 0xa04   : > { %v1679_v24 = vadd.f32 1e-06, %v1675_v63  ;;  %v1660_v1 = vand.u32 2147483647, %v1656_v0  ;;  %v2292_v2 = vunpack.i.h.bf16 %v2290_v18  ;;  %v2291_v3 = vunpack.i.l.bf16 %v2290_v18  ;;  %v2346_v4 = vpop.eup %2345 }
 0xa05   : > { %v1689_v6 = vpack.c.bf16 %v1686_v61, %v1685_v21 }
 0xa06   : > { %v1676_v25 = vmax.f32 %v1660_v1, %v2346_v4  ;;  %v1540_v8 = vpack.c.bf16 %v2292_v2, %v2291_v3  ;;  %2347 = vrcp.f32 %v1679_v24  ;;  %v2303_v4 = vld [vmem:[%s2931_s16 + $0x18] sm:$0xff]  }
 0xa07   : > { %2242 = vmatmul.mubr.msk.bf16.vlgmr.msra.gmra.mxu0 %vm1498_vm4, %v1689_v6  ;;  %2252 = vmatpush3.bf16.msra.mxu1 %v2303_v4 }
 0xa08   : > { %v1680_v10 = vadd.f32 1e-06, %v1676_v25  ;;  %2246 = vmatpush3.bf16.msra.mxu0 %v1540_v8  ;;  %2247 = vmatprep.mubr.msk.bf16.mxu0 %vm2378_vm1, %v2377_v15  ;;  %vm1854_vm1 = vcmask 523520  }
 0xa09   : > { %2253 = vmatprep.subr.bf16.mxu1 %v2377_v15 }
 0xa0a   : > { %2349 = vrcp.f32 %v1680_v10  ;;  %v1831_v10 = vld [vmem:[%s2929_s14] sm:$0x3] }
 0xa0b   : > { %2351 = vpow2.f32 %v2075_v14  ;;  %v2368_v14 = vld [vmem:[%s2498_s1 + $0x8] sm:$0xff] }
 0xa0c   : > { %2353 = vpow2.f32 %v2076_v43 }
 0xa13   : > { %v2348_v11 = vpop.eup %2347 }
 0xa14   : > { %v1687_v16 = vmul.f32 %v2348_v11, %v1643_v36 }
 0xa17   : > { %v2350_v13 = vpop.eup %2349 }
 0xa18   : > { %v1688_v17 = vmul.f32 %v2350_v13, %v1644_v38  ;;  %v2352_v60 = vpop.eup %2351  ;;  %v1843_v13 = vrot.slane %v1831_v10, %v739_v50 }
 0xa19   : > { %v1876_v0 = vadd.f32 1.0, %v2352_v60  ;;  %v2354_v18 = vpop.eup %2353 }
 0xa1a   : > { %v1690_v19 = vpack.c.bf16 %v1688_v17, %v1687_v16  ;;  %v1877_v2 = vadd.f32 1.0, %v2354_v18  ;;  %v2304_v17 = vld [vmem:[%s2931_s16 + $0x10] sm:$0xff]  }
 0xa1b   : > { %2254 = vmatpush3.bf16.msra.mxu1 %v2304_v17 }
 0xa1c   : > { %2248 = vmatmul.mubr.msk.bf16.vlgmr.msra.gmra.mxu0 %vm1498_vm4, %v1690_v19  ;;  %2255 = vmatprep.subr.bf16.mxu1 %v2377_v15 }
 0xac7   : > { %v1728_v20 = vpop.f32.mrf.mxu0 }
 0xac8   : > { %v1779_v36 = vsel %vm579_vm0, %v1728_v20, 0.0 }
 0xac9   : > { %v2243_v22 = vpop.f32.mrf.mxu0 }
 0xacb   : > { %v1731_v23 = vpop.f32.mrf.mxu0 }
 0xacc   : > { %v1782_v37 = vsel %vm579_vm0, %v1731_v23, 0.0 }
 0xacd   : > { %v2244_v26 = vpop.f32.mrf.mxu0 }
 0xace   : > { %v2305_v26 = vld [vmem:[%s2931_s16 + $0x8] sm:$0xff]  }
 0xacf   : > { %2256 = vmatpush3.bf16.msra.mxu1 %v2305_v26 }
 0xad0   : > { %2257 = vmatprep.subr.bf16.mxu1 %v2377_v15 }
 0xadc   : > { %v1772_v27 = vpop.f32.mrf.mxu0 }
 0xadd   : > { %v1785_v28 = vsel %vm579_vm0, %v1772_v27, 0.0 }
 0xade   : > { %1786 = vadd.xlane.f32.xlu0 %v1785_v28  ;;  %v2249_v29 = vpop.f32.mrf.mxu0 }
 0xadf   : > { %v1835_v29 = vrot.slane %v1831_v10, %v2576_v49 }
 0xae0   : > { %v1775_v31 = vpop.f32.mrf.mxu0 }
 0xae1   : > { %v1788_v34 = vsel %vm579_vm0, %v1775_v31, 0.0 }
 0xae2   : > { %1789 = vadd.xlane.f32.xlu0 %v1788_v34  ;;  %v2250_v7 = vpop.f32.mrf.mxu0  ;;  %v2306_v34 = vld [vmem:[%s2931_s16] sm:$0xff]  }
 0xae3   : > { %2258 = vmatpush3.bf16.msra.mxu1 %v2306_v34 }
 0xae6   : > { %1780 = vadd.xlane.f32.xlu0 %v1779_v36 }
 0xaea   : > { %1783 = vadd.xlane.f32.xlu0 %v1782_v37 }
 0xb67   : > { %v1787_v38 = vpop.xlane.xlu0 %1786 }
 0xb68   : > { %v1793_v5 = vmul.f32 0.03125, %v1787_v38 }
 0xb6a   : > { %v1797_v35 = vsub.f32 %v1772_v27, %v1793_v5 }
 0xb6b   : > { %v1790_v41 = vpop.xlane.xlu0 %1789 }
 0xb6c   : > { %v1794_v32 = vmul.f32 0.03125, %v1790_v41  ;;  %v1801_v45 = vmul.f32 %v1797_v35, %v1797_v35 }
 0xb6e   : > { %v1798_v30 = vsub.f32 %v1775_v31, %v1794_v32  ;;  %v1809_v46 = vsel %vm579_vm0, %v1801_v45, 0.0 }
 0xb6f   : > { %1810 = vadd.xlane.f32.xlu1 %v1809_v46  ;;  %v1781_v47 = vpop.xlane.xlu0 %1780 }
 0xb70   : > { %v1791_v48 = vmul.f32 0.03125, %v1781_v47  ;;  %v1802_v42 = vmul.f32 %v1798_v30, %v1798_v30 }
 0xb72   : > { %v2852_v33 = vsub.f32 %v1728_v20, %v1791_v48  ;;  %v1812_v52 = vsel %vm579_vm0, %v1802_v42, 0.0 }
 0xb73   : > { %1813 = vadd.xlane.f32.xlu0 %v1812_v52  ;;  %v1784_v53 = vpop.xlane.xlu0 %1783 }
 0xb74   : > { %v1792_v54 = vmul.f32 0.03125, %v1784_v53  ;;  %v1799_v55 = vmul.f32 %v2852_v33, %v2852_v33  ;;  %v2077_v53 = vld [vmem:[%s2932_s17] ss:$0 sm:$0xff] }
 0xb76   : > { %v2857_v57 = vsub.f32 %v1731_v23, %v1792_v54  ;;  %v1803_v58 = vsel %vm579_vm0, %v1799_v55, 0.0 }
 0xb77   : > { %1804 = vadd.xlane.f32.xlu0 %v1803_v58 }
 0xb78   : > { %v1800_v9 = vmul.f32 %v2857_v57, %v2857_v57 }
 0xb7a   : > { %v1806_v12 = vsel %vm579_vm0, %v1800_v9, 0.0 }
 0xb7b   : > { %1807 = vadd.xlane.f32.xlu0 %v1806_v12 }
 0xbf8   : > { %v1811_v59 = vpop.xlane.xlu1 %1810 }
 0xbf9   : > { %v1817_v61 = vmul.f32 0.03125, %v1811_v59 }
 0xbfb   : > { %v1821_v62 = vadd.f32 1e-05, %v1817_v61 }
 0xbfc   : > { %v1814_v63 = vpop.xlane.xlu0 %1813 }
 0xbfd   : > { %2355 = vrsqrt.f32 %v1821_v62  ;;  %v1818_v21 = vmul.f32 0.03125, %v1814_v63 }
 0xbfe   : > { %2357 = vrcp.f32 %v1876_v0 }
 0xbff   : > { %v1822_v24 = vadd.f32 1e-05, %v1818_v21 }
 0xc00   : > { %v1805_v1 = vpop.xlane.xlu0 %1804 }
 0xc01   : > { %2359 = vrsqrt.f32 %v1822_v24  ;;  %v1815_v3 = vmul.f32 0.03125, %v1805_v1 }
 0xc02   : > { %2361 = vrcp.f32 %v1877_v2 }
 0xc03   : > { %v1819_v6 = vadd.f32 1e-05, %v1815_v3 }
 0xc04   : > { %v1808_v25 = vpop.xlane.xlu0 %1807 }
 0xc05   : > { %2363 = vrsqrt.f32 %v1819_v6  ;;  %v1816_v8 = vmul.f32 0.03125, %v1808_v25 }
 0xc07   : > { %v1820_v11 = vadd.f32 1e-05, %v1816_v8 }
 0xc09   : > { %2365 = vrsqrt.f32 %v1820_v11 }
 0xc0a   : > { %v2356_v16 = vpop.eup %2355 }
 0xc0b   : > { %v1829_v19 = vmul.f32 %v2356_v16, %v1797_v35  ;;  %v2358_v20 = vpop.eup %2357 }
 0xc0c   : > { %v1882_v27 = vmul.f32 %v2358_v20, %v2579_v51 }
 0xc0d   : > { %v1844_v22 = vmul.f32 %v1843_v13, %v1829_v19 }
 0xc0e   : > { %v2360_v23 = vpop.eup %2359 }
 0xc0f   : > { %1848 = vrot.lane.b32.xlu0 %v1844_v22, %s2386_s22  ;;  %v1830_v44 = vmul.f32 %v2360_v23, %v1798_v30  ;;  %v2362_v50 = vpop.eup %2361 }
 0xc10   : > { %v1883_v36 = vmul.f32 %v2362_v50, %v2583_v56  ;;  %v2074_v56 = vld [vmem:[%s2930_s15] ss:$0 sm:$0xff] }
 0xc11   : > { %v1845_v28 = vmul.f32 %v1843_v13, %v1830_v44  ;;  %v1866_v32 = vmul.f32 %v2074_v56, %v2627_v40  ;;  %v1867_v30 = vmul.f32 %v2074_v56, %v2625_v39  ;;  %v2367_v40 = vld [vmem:[%s2498_s1] sm:$0xff] }
 0xc12   : > { %v2364_v31 = vpop.eup %2363 }
 0xc13   : > { %1886 = vrot.lane.b32.xlu0 %v1882_v27, %s2383_s21  ;;  %1850 = vrot.lane.b32.xlu1 %v1845_v28, %s2386_s22  ;;  %v1827_v7 = vmul.f32 %v2364_v31, %v2852_v33 }
 0xc15   : > { %v1836_v37 = vmul.f32 %v1835_v29, %v1827_v7 }
 0xc16   : > { %v2366_v51 = vpop.eup %2365 }
 0xc17   : > { %1888 = vrot.lane.b32.xlu0 %v1883_v36, %s2383_s21  ;;  %1838 = vst.msk [vmem:[#allocation2] sm:$0xff] %vm579_vm0, %v1836_v37  ;;  %v1828_v15 = vmul.f32 %v2366_v51, %v2857_v57 }
 0xc19   : > { %v1837_v49 = vmul.f32 %v1835_v29, %v1828_v15 }
 0xc1b   : > { %1839 = vst.msk [vmem:[#allocation2 + $0x8] sm:$0xff] %vm579_vm0, %v1837_v49 }
 0xc81   : > { %v1849_v38 = vpop.permute.xlu0 %1848 }
 0xc82   : > { %1855 = vst.msk [vmem:[#allocation2] sm:$0xff] %vm1854_vm1, %v1849_v38 }
 0xc85   : > { %v1851_v5 = vpop.permute.xlu1 %1850  ;;  %v1887_v41 = vpop.permute.xlu0 %1886 }
 0xc86   : > { %1856 = vst.msk [vmem:[#allocation2 + $0x8] sm:$0xff] %vm1854_vm1, %v1851_v5 }
 0xc89   : > { %v1857_v35 = vld [vmem:[#allocation2] sm:$0xff]  ;;  %v1889_v48 = vpop.permute.xlu0 %1888 }
 0xc8a   : > { %v1868_v45 = vadd.f32 %v1866_v32, %v1857_v35 }
 0xc8c   : > { %v1892_v42 = vmul.f32 %v1887_v41, %v1868_v45 }
 0xc8d   : > { %v1858_v46 = vld [vmem:[#allocation2 + $0x8] sm:$0xff] }
 0xc8e   : > { %v1869_v47 = vadd.f32 %v1867_v30, %v1858_v46 }
 0xc90   : > { %v1893_v33 = vmul.f32 %v1889_v48, %v1869_v47 }
 0xc92   : > { %v1894_v52 = vpack.c.bf16 %v1893_v33, %v1892_v42 }
 0xc94   : > { %2260 = vmatmul.mubr.msk.bf16.vlgmr.msra.gmra.mxu1 %vm830_vm2, %v1894_v52 }
 0xd54   : > { %v1971_v54 = vpop.f32.mrf.mxu1 }
 0xd55   : > { %v1972_v55 = vadd.f32 %v2077_v53, %v1971_v54 }
 0xd56   : > { %v2261_v39 = vpop.f32.mrf.mxu1 }
 0xd57   : > { %v1978_v57 = vadd.f32 %v2367_v40, %v1972_v55 }
 0xd58   : > { %v1974_v58 = vpop.f32.mrf.mxu1 }
 0xd59   : > { %1980 = vst.msk [vmem:[%s575_s19] sm:$0xff] %vm579_vm0, %v1978_v57  ;;  %v1975_v9 = vadd.f32 %v2077_v53, %v1974_v58 }
 0xd5a   : > { %v2262_v12 = vpop.f32.mrf.mxu1 }
 0xd5b   : > { %v1979_v43 = vadd.f32 %v2368_v14, %v1975_v9 }
 0xd5d   : > { %1981 = vst.msk [vmem:[%s575_s19 + $0x8] sm:$0xff] %vm579_vm0, %v1979_v43 }
 0xd5e PF: > { %s28_s27 = sadd.s32 1, %s2375_s27  }
 0xd5f   : > { %p25_p4 = scmp.ge.s32.totalorder %s28_s27, 4  }
 0xd61   :  { %27 = sbr.rel (!%p25_p4) target bundleno = 4 (0x4), region = 122 }

</bundles_post_ra>
